<compile_context>
chip_gen: v7x
topology: tpu7x:2x2x1
jax: 0.10.0
libtpu: 0.0.40
codegen_flags: <defaults>
</compile_context>

<pallas_src>
import functools

import jax
import jax.numpy as jnp
from jax import lax
from jax.experimental import pallas as pl
from jax.experimental.pallas import tpu as pltpu


_NUM_SUMS = 7      # inter, sum(t), sum(p), sum(skp*t), sum(skp), sum(skt*p), sum(skt)
_OUT_LANES = 128   # lane-dense partial-sum row per grid step


def _soft_dice_cldice_kernel(t_ref, p_ref, out_ref, *, width, height, iters):
    """One grid step: soft-skeletonize a block of whole planes and emit the
    seven partial sums for this block (combined in the JAX wrapper)."""
    t = t_ref[...].astype(jnp.float32)   # (rows, H*W) target planes
    p = p_ref[...].astype(jnp.float32)   # (rows, H*W) prediction planes
    d = t.shape[1]

    # Boundary masks depend only on the (static) flattened column index, so
    # build them once at shape (1, d) and let the wheres broadcast over rows.
    col = lax.broadcasted_iota(jnp.int32, (1, d), 1)
    wcol = col % width
    not_left = wcol != 0
    not_right = wcol != (width - 1)
    not_top = col >= width
    not_bot = col < (height - 1) * width

    pos = jnp.float32(jnp.inf)
    neg = jnp.float32(-jnp.inf)

    def nbr(a, s):
        # Value of the neighbor `s` positions before each element along the
        # flattened plane axis (XLU rotate); wrap-around entries are always
        # masked by the caller with +/-inf before use.
        return pltpu.roll(a, s % d, axis=1)

    def pool_w(a, is_min):
        lft = nbr(a, 1)      # neighbor at w-1
        rgt = nbr(a, -1)     # neighbor at w+1
        if is_min:
            lft = jnp.where(not_left, lft, pos)
            rgt = jnp.where(not_right, rgt, pos)
            return jnp.minimum(a, jnp.minimum(lft, rgt))
        lft = jnp.where(not_left, lft, neg)
        rgt = jnp.where(not_right, rgt, neg)
        return jnp.maximum(a, jnp.maximum(lft, rgt))

    def pool_h(a, is_min):
        up = nbr(a, width)    # neighbor at h-1
        dn = nbr(a, -width)   # neighbor at h+1
        if is_min:
            up = jnp.where(not_top, up, pos)
            dn = jnp.where(not_bot, dn, pos)
            return jnp.minimum(a, jnp.minimum(up, dn))
        up = jnp.where(not_top, up, neg)
        dn = jnp.where(not_bot, dn, neg)
        return jnp.maximum(a, jnp.maximum(up, dn))

    def soft_erode(a):
        # min(vertical 3-min, horizontal 3-min) -- matches
        # torch.min(-maxpool(-x,(3,1)), -maxpool(-x,(1,3))) with +inf padding.
        return jnp.minimum(pool_h(a, True), pool_w(a, True))

    def soft_dilate(a):
        # 3x3 max pool (separable) with implicit -inf padding.
        return pool_h(pool_w(a, False), False)

    def soft_skel(a):
        # Erode-sharing restructure of the reference
        #   skel = relu(a - open(a)); repeat: a = erode(a);
        #          delta = relu(a - open(a)); skel += relu(delta - skel*delta)
        # open(x) = dilate(erode(x)), so each erode result is reused both as
        # the next iterate and inside the open() of the current one
        # (4 erodes instead of 7 for iters=3; numerically identical).
        img = a
        er = soft_erode(img)
        skel = jnp.maximum(img - soft_dilate(er), 0.0)
        for _ in range(iters):
            img = er
            er = soft_erode(img)
            delta = jnp.maximum(img - soft_dilate(er), 0.0)
            skel = skel + jnp.maximum(delta - skel * delta, 0.0)
        return skel

    skel_p = soft_skel(p)
    skel_t = soft_skel(t)

    sums = (
        jnp.sum(t * p),        # intersection
        jnp.sum(t),
        jnp.sum(p),
        jnp.sum(skel_p * t),   # tprec numerator
        jnp.sum(skel_p),
        jnp.sum(skel_t * p),   # tsens numerator
        jnp.sum(skel_t),
    )

    # Write this block's partial sums into lanes 0..6 of sublane 0 of an
    # (8, 128)-aligned output tile (duplicated across sublanes; the wrapper
    # reads sublane 0 only).
    lane = lax.broadcasted_iota(jnp.int32, (1, 8, _OUT_LANES), 2)
    vec = jnp.zeros((1, 8, _OUT_LANES), jnp.float32)
    for j, s in enumerate(sums):
        vec = jnp.where(lane == j, s, vec)
    out_ref[...] = vec


def soft_dice_cldice(y_true, y_pred, *, iters=3, alpha=0.5, smooth=1e-5):
    """Pallas implementation of soft_dice_cldice.forward(y_true, y_pred)."""
    assert y_true.shape == y_pred.shape and y_true.ndim == 4
    n, c, h, w = y_true.shape
    assert h >= 2 and w >= 2
    nc, d = n * c, h * w

    # Free reshapes; keep the original dtype (cast happens inside the kernel).
    t = y_true.reshape(nc, d)
    p = y_pred.reshape(nc, d)

    # --- generation-aware VMEM budget -------------------------------------
    try:
        vmem_cap = int(pltpu.get_tpu_info().vmem_capacity_bytes)
    except Exception:
        vmem_cap = 128 * 1024 * 1024
    vmem_limit = int(min(48 * 1024 * 1024,
                         max(16 * 1024 * 1024, (vmem_cap * 3) // 8)))
    # f32 elements per (rows, d) slab: ~10 live slabs inside soft_skel plus
    # double-buffered inputs must fit inside vmem_limit.
    budget_elems = max(8 * 128, vmem_limit // (24 * 4))
    budget_rows = max(1, budget_elems // d)

    # Give the "parallel" grid axis at least two steps when there is enough
    # work, so v7x can spread blocks over both TensorCores.
    if nc >= 16:
        budget_rows = min(budget_rows, max(8, -(-nc // 2)))

    if nc <= budget_rows:
        rows, pad_rows = nc, 0
    else:
        # Prefer a multiple-of-8 block height that divides nc, so the inputs
        # are never padded/copied in HBM by the wrapper.
        max_rows = (budget_rows // 8) * 8
        rows = 0
        r = max_rows
        while r >= 8:
            if nc % r == 0:
                rows = r
                break
            r -= 8
        if rows:
            pad_rows = 0
        else:
            # Fallback: pad with zero planes (an all-zero plane has an
            # all-zero soft skeleton, so it adds exactly zero to every sum).
            rows = max(8, max_rows)
            pad_rows = (-nc) % rows
    # TODO(synk): planes so large that even ~8 rows exceed the VMEM budget
    # need (H, W)-shaped halo-tiled blocks; blocks here always hold whole
    # flattened planes.

    if pad_rows:
        t = jnp.pad(t, ((0, pad_rows), (0, 0)))
        p = jnp.pad(p, ((0, pad_rows), (0, 0)))
    num_steps = (nc + pad_rows) // rows

    kernel = functools.partial(
        _soft_dice_cldice_kernel, width=w, height=h, iters=int(iters))

    partials = pl.pallas_call(
        kernel,
        out_shape=jax.ShapeDtypeStruct((num_steps, 8, _OUT_LANES), jnp.float32),
        grid_spec=pltpu.PrefetchScalarGridSpec(
            num_scalar_prefetch=0,
            grid=(num_steps,),
            in_specs=[
                pl.BlockSpec((rows, d), lambda i: (i, 0)),
                pl.BlockSpec((rows, d), lambda i: (i, 0)),
            ],
            out_specs=pl.BlockSpec((1, 8, _OUT_LANES), lambda i: (i, 0, 0)),
        ),
        compiler_params=pltpu.CompilerParams(
            dimension_semantics=("parallel",),
            vmem_limit_bytes=vmem_limit,
        ),
    )(t, p)

    # Combine per-block partial sums and finish the scalar loss in XLA.
    sums = jnp.sum(partials[:, 0, :], axis=0)
    inter, t_sum, p_sum, skpt, skp, sktp, skt = (sums[i]
                                                 for i in range(_NUM_SUMS))
    sm = jnp.float32(smooth)
    dice = 1.0 - (2.0 * inter + sm) / (t_sum + p_sum + sm)
    tprec = (skpt + sm) / (skp + sm)
    tsens = (sktp + sm) / (skt + sm)
    cl_dice = 1.0 - 2.0 * (tprec * tsens) / (tprec + tsens)
    return (1.0 - alpha) * dice + alpha * cl_dice


# ----------------------------- pure-JAX reference ---------------------------

def _max_pool_ref(x, kh, kw):
    return lax.reduce_window(
        x, jnp.array(-jnp.inf, x.dtype), lax.max,
        window_dimensions=(1, 1, kh, kw),
        window_strides=(1, 1, 1, 1),
        padding=((0, 0), (0, 0), (kh // 2, kh // 2), (kw // 2, kw // 2)))


def _soft_erode_ref(img):
    p1 = -_max_pool_ref(-img, 3, 1)
    p2 = -_max_pool_ref(-img, 1, 3)
    return jnp.minimum(p1, p2)


def _soft_dilate_ref(img):
    return _max_pool_ref(img, 3, 3)


def _soft_open_ref(img):
    return _soft_dilate_ref(_soft_erode_ref(img))


def _soft_skel_ref(img, iters):
    skel = jax.nn.relu(img - _soft_open_ref(img))
    for _ in range(iters):
        img = _soft_erode_ref(img)
        delta = jax.nn.relu(img - _soft_open_ref(img))
        skel = skel + jax.nn.relu(delta - skel * delta)
    return skel


def soft_dice_cldice_ref(y_true, y_pred, iters=3, alpha=0.5, smooth=1e-5):
    t = y_true.astype(jnp.float32)
    p = y_pred.astype(jnp.float32)
    inter = jnp.sum(t * p)
    dice = 1.0 - (2.0 * inter + smooth) / (jnp.sum(t) + jnp.sum(p) + smooth)
    skel_p = _soft_skel_ref(p, iters)
    skel_t = _soft_skel_ref(t, iters)
    tprec = (jnp.sum(skel_p * t) + smooth) / (jnp.sum(skel_p) + smooth)
    tsens = (jnp.sum(skel_t * p) + smooth) / (jnp.sum(skel_t) + smooth)
    cl_dice = 1.0 - 2.0 * (tprec * tsens) / (tprec + tsens)
    return (1.0 - alpha) * dice + alpha * cl_dice


if __name__ == "__main__":
    key = jax.random.PRNGKey(0)
    k1, k2 = jax.random.split(key)
    shape = (2, 4, 16, 16)                       # N, C, H, W
    y_pred = jax.random.uniform(k1, shape, dtype=jnp.float32)
    y_true = (jax.random.uniform(k2, shape, dtype=jnp.float32) > 0.5
              ).astype(jnp.float32)

    out = soft_dice_cldice(y_true, y_pred)
    out = jax.block_until_ready(out)

    ref = soft_dice_cldice_ref(y_true, y_pred)
    assert jnp.allclose(out, ref, atol=1e-5, rtol=1e-5), (out, ref)
    print("KERNEL_OK")
</pallas_src>

<mosaic_0001>
module attributes {stable_mosaic.version = 11 : i64} {
  func.func @_soft_dice_cldice_kernel(%arg0: i32, %arg1: memref<8x256xf32, #tpu.memory_space<vmem>>, %arg2: memref<8x256xf32, #tpu.memory_space<vmem>>, %arg3: memref<1x8x128xf32, #tpu.memory_space<vmem>>) attributes {dimension_semantics = [#tpu.dimension_semantics<parallel>], iteration_bounds = array<i64: 1>, scalar_prefetch = 0 : i64, scratch_operands = 0 : i64, tpu.core_type = #tpu.core_type<tc>, window_params = [{transform_indices = @transform_0, window_bounds = array<i64: 8, 256>}, {transform_indices = @transform_1, window_bounds = array<i64: 8, 256>}, {transform_indices = @transform_2, window_bounds = array<i64: 1, 8, 128>}]} {
    %c0 = arith.constant 0 : index
    %c0_0 = arith.constant 0 : index
    %0 = vector.load %arg1[%c0, %c0_0] : memref<8x256xf32, #tpu.memory_space<vmem>>, vector<8x256xf32>
    %c0_1 = arith.constant 0 : index
    %c0_2 = arith.constant 0 : index
    %1 = vector.load %arg2[%c0_1, %c0_2] : memref<8x256xf32, #tpu.memory_space<vmem>>, vector<8x256xf32>
    %2 = tpu.iota {dimensions = array<i32: 1>} : vector<1x256xi32>
    %c16_i32 = arith.constant 16 : i32
    %c0_i32 = arith.constant 0 : i32
    %3 = arith.cmpi eq, %c16_i32, %c0_i32 : i32
    %c1_i32 = arith.constant 1 : i32
    %4 = arith.select %3, %c1_i32, %c16_i32 : i32
    %5 = vector.broadcast %4 : i32 to vector<1x256xi32>
    %6 = arith.remsi %2, %5 : vector<1x256xi32>
    %c0_i32_3 = arith.constant 0 : i32
    %7 = vector.broadcast %c0_i32_3 : i32 to vector<1x256xi32>
    %8 = arith.cmpi ne, %6, %7 : vector<1x256xi32>
    %c0_i32_4 = arith.constant 0 : i32
    %9 = vector.broadcast %c0_i32_4 : i32 to vector<1x256xi32>
    %10 = arith.cmpi slt, %6, %9 : vector<1x256xi32>
    %c0_i32_5 = arith.constant 0 : i32
    %11 = arith.cmpi slt, %4, %c0_i32_5 : i32
    %12 = vector.broadcast %11 : i1 to vector<1x256xi1>
    %13 = vector.broadcast %12 : vector<1x256xi1> to vector<1x256xi1>
    %14 = arith.xori %10, %13 : vector<1x256xi1>
    %15 = arith.andi %14, %8 : vector<1x256xi1>
    %16 = vector.broadcast %4 : i32 to vector<1x256xi32>
    %17 = arith.addi %6, %16 : vector<1x256xi32>
    %18 = arith.select %15, %17, %6 : vector<1x256xi1>, vector<1x256xi32>
    %c0_i32_6 = arith.constant 0 : i32
    %19 = vector.broadcast %c0_i32_6 : i32 to vector<1x256xi32>
    %20 = arith.cmpi ne, %18, %19 : vector<1x256xi32>
    %c15_i32 = arith.constant 15 : i32
    %21 = vector.broadcast %c15_i32 : i32 to vector<1x256xi32>
    %22 = arith.cmpi ne, %18, %21 : vector<1x256xi32>
    %c16_i32_7 = arith.constant 16 : i32
    %23 = vector.broadcast %c16_i32_7 : i32 to vector<1x256xi32>
    %24 = arith.cmpi sge, %2, %23 : vector<1x256xi32>
    %c240_i32 = arith.constant 240 : i32
    %25 = vector.broadcast %c240_i32 : i32 to vector<1x256xi32>
    %26 = arith.cmpi slt, %2, %25 : vector<1x256xi32>
    %c16_i32_8 = arith.constant 16 : i32
    %27 = tpu.dynamic_rotate %1 by %c16_i32_8 dim 1 : vector<8x256xf32>, i32 -> vector<8x256xf32>
    %c240_i32_9 = arith.constant 240 : i32
    %28 = tpu.dynamic_rotate %1 by %c240_i32_9 dim 1 : vector<8x256xf32>, i32 -> vector<8x256xf32>
    %cst = arith.constant 0x7F800000 : f32
    %29 = vector.shape_cast %24 : vector<1x256xi1> to vector<1x256xi1>
    %30 = vector.broadcast %29 : vector<1x256xi1> to vector<8x256xi1>
    %31 = vector.broadcast %cst : f32 to vector<8x256xf32>
    %32 = arith.select %30, %27, %31 : vector<8x256xi1>, vector<8x256xf32>
    %cst_10 = arith.constant 0x7F800000 : f32
    %33 = vector.shape_cast %26 : vector<1x256xi1> to vector<1x256xi1>
    %34 = vector.broadcast %33 : vector<1x256xi1> to vector<8x256xi1>
    %35 = vector.broadcast %cst_10 : f32 to vector<8x256xf32>
    %36 = arith.select %34, %28, %35 : vector<8x256xi1>, vector<8x256xf32>
    %37 = arith.minimumf %32, %36 : vector<8x256xf32>
    %38 = arith.minimumf %1, %37 : vector<8x256xf32>
    %c1_i32_11 = arith.constant 1 : i32
    %39 = tpu.dynamic_rotate %1 by %c1_i32_11 dim 1 : vector<8x256xf32>, i32 -> vector<8x256xf32>
    %c255_i32 = arith.constant 255 : i32
    %40 = tpu.dynamic_rotate %1 by %c255_i32 dim 1 : vector<8x256xf32>, i32 -> vector<8x256xf32>
    %cst_12 = arith.constant 0x7F800000 : f32
    %41 = vector.shape_cast %20 : vector<1x256xi1> to vector<1x256xi1>
    %42 = vector.broadcast %41 : vector<1x256xi1> to vector<8x256xi1>
    %43 = vector.broadcast %cst_12 : f32 to vector<8x256xf32>
    %44 = arith.select %42, %39, %43 : vector<8x256xi1>, vector<8x256xf32>
    %cst_13 = arith.constant 0x7F800000 : f32
    %45 = vector.shape_cast %22 : vector<1x256xi1> to vector<1x256xi1>
    %46 = vector.broadcast %45 : vector<1x256xi1> to vector<8x256xi1>
    %47 = vector.broadcast %cst_13 : f32 to vector<8x256xf32>
    %48 = arith.select %46, %40, %47 : vector<8x256xi1>, vector<8x256xf32>
    %49 = arith.minimumf %44, %48 : vector<8x256xf32>
    %50 = arith.minimumf %1, %49 : vector<8x256xf32>
    %51 = arith.minimumf %38, %50 : vector<8x256xf32>
    %c1_i32_14 = arith.constant 1 : i32
    %52 = tpu.dynamic_rotate %51 by %c1_i32_14 dim 1 : vector<8x256xf32>, i32 -> vector<8x256xf32>
    %c255_i32_15 = arith.constant 255 : i32
    %53 = tpu.dynamic_rotate %51 by %c255_i32_15 dim 1 : vector<8x256xf32>, i32 -> vector<8x256xf32>
    %cst_16 = arith.constant 0xFF800000 : f32
    %54 = vector.shape_cast %20 : vector<1x256xi1> to vector<1x256xi1>
    %55 = vector.broadcast %54 : vector<1x256xi1> to vector<8x256xi1>
    %56 = vector.broadcast %cst_16 : f32 to vector<8x256xf32>
    %57 = arith.select %55, %52, %56 : vector<8x256xi1>, vector<8x256xf32>
    %cst_17 = arith.constant 0xFF800000 : f32
    %58 = vector.shape_cast %22 : vector<1x256xi1> to vector<1x256xi1>
    %59 = vector.broadcast %58 : vector<1x256xi1> to vector<8x256xi1>
    %60 = vector.broadcast %cst_17 : f32 to vector<8x256xf32>
    %61 = arith.select %59, %53, %60 : vector<8x256xi1>, vector<8x256xf32>
    %62 = arith.maximumf %57, %61 : vector<8x256xf32>
    %63 = arith.maximumf %51, %62 : vector<8x256xf32>
    %c16_i32_18 = arith.constant 16 : i32
    %64 = tpu.dynamic_rotate %63 by %c16_i32_18 dim 1 : vector<8x256xf32>, i32 -> vector<8x256xf32>
    %c240_i32_19 = arith.constant 240 : i32
    %65 = tpu.dynamic_rotate %63 by %c240_i32_19 dim 1 : vector<8x256xf32>, i32 -> vector<8x256xf32>
    %cst_20 = arith.constant 0xFF800000 : f32
    %66 = vector.shape_cast %24 : vector<1x256xi1> to vector<1x256xi1>
    %67 = vector.broadcast %66 : vector<1x256xi1> to vector<8x256xi1>
    %68 = vector.broadcast %cst_20 : f32 to vector<8x256xf32>
    %69 = arith.select %67, %64, %68 : vector<8x256xi1>, vector<8x256xf32>
    %cst_21 = arith.constant 0xFF800000 : f32
    %70 = vector.shape_cast %26 : vector<1x256xi1> to vector<1x256xi1>
    %71 = vector.broadcast %70 : vector<1x256xi1> to vector<8x256xi1>
    %72 = vector.broadcast %cst_21 : f32 to vector<8x256xf32>
    %73 = arith.select %71, %65, %72 : vector<8x256xi1>, vector<8x256xf32>
    %74 = arith.maximumf %69, %73 : vector<8x256xf32>
    %75 = arith.maximumf %63, %74 : vector<8x256xf32>
    %76 = arith.subf %1, %75 : vector<8x256xf32>
    %cst_22 = arith.constant 0.000000e+00 : f32
    %77 = vector.broadcast %cst_22 : f32 to vector<8x256xf32>
    %78 = arith.maximumf %76, %77 : vector<8x256xf32>
    %c16_i32_23 = arith.constant 16 : i32
    %79 = tpu.dynamic_rotate %51 by %c16_i32_23 dim 1 : vector<8x256xf32>, i32 -> vector<8x256xf32>
    %c240_i32_24 = arith.constant 240 : i32
    %80 = tpu.dynamic_rotate %51 by %c240_i32_24 dim 1 : vector<8x256xf32>, i32 -> vector<8x256xf32>
    %cst_25 = arith.constant 0x7F800000 : f32
    %81 = vector.shape_cast %24 : vector<1x256xi1> to vector<1x256xi1>
    %82 = vector.broadcast %81 : vector<1x256xi1> to vector<8x256xi1>
    %83 = vector.broadcast %cst_25 : f32 to vector<8x256xf32>
    %84 = arith.select %82, %79, %83 : vector<8x256xi1>, vector<8x256xf32>
    %cst_26 = arith.constant 0x7F800000 : f32
    %85 = vector.shape_cast %26 : vector<1x256xi1> to vector<1x256xi1>
    %86 = vector.broadcast %85 : vector<1x256xi1> to vector<8x256xi1>
    %87 = vector.broadcast %cst_26 : f32 to vector<8x256xf32>
    %88 = arith.select %86, %80, %87 : vector<8x256xi1>, vector<8x256xf32>
    %89 = arith.minimumf %84, %88 : vector<8x256xf32>
    %90 = arith.minimumf %51, %89 : vector<8x256xf32>
    %c1_i32_27 = arith.constant 1 : i32
    %91 = tpu.dynamic_rotate %51 by %c1_i32_27 dim 1 : vector<8x256xf32>, i32 -> vector<8x256xf32>
    %c255_i32_28 = arith.constant 255 : i32
    %92 = tpu.dynamic_rotate %51 by %c255_i32_28 dim 1 : vector<8x256xf32>, i32 -> vector<8x256xf32>
    %cst_29 = arith.constant 0x7F800000 : f32
    %93 = vector.shape_cast %20 : vector<1x256xi1> to vector<1x256xi1>
    %94 = vector.broadcast %93 : vector<1x256xi1> to vector<8x256xi1>
    %95 = vector.broadcast %cst_29 : f32 to vector<8x256xf32>
    %96 = arith.select %94, %91, %95 : vector<8x256xi1>, vector<8x256xf32>
    %cst_30 = arith.constant 0x7F800000 : f32
    %97 = vector.shape_cast %22 : vector<1x256xi1> to vector<1x256xi1>
    %98 = vector.broadcast %97 : vector<1x256xi1> to vector<8x256xi1>
    %99 = vector.broadcast %cst_30 : f32 to vector<8x256xf32>
    %100 = arith.select %98, %92, %99 : vector<8x256xi1>, vector<8x256xf32>
    %101 = arith.minimumf %96, %100 : vector<8x256xf32>
    %102 = arith.minimumf %51, %101 : vector<8x256xf32>
    %103 = arith.minimumf %90, %102 : vector<8x256xf32>
    %c1_i32_31 = arith.constant 1 : i32
    %104 = tpu.dynamic_rotate %103 by %c1_i32_31 dim 1 : vector<8x256xf32>, i32 -> vector<8x256xf32>
    %c255_i32_32 = arith.constant 255 : i32
    %105 = tpu.dynamic_rotate %103 by %c255_i32_32 dim 1 : vector<8x256xf32>, i32 -> vector<8x256xf32>
    %cst_33 = arith.constant 0xFF800000 : f32
    %106 = vector.shape_cast %20 : vector<1x256xi1> to vector<1x256xi1>
    %107 = vector.broadcast %106 : vector<1x256xi1> to vector<8x256xi1>
    %108 = vector.broadcast %cst_33 : f32 to vector<8x256xf32>
    %109 = arith.select %107, %104, %108 : vector<8x256xi1>, vector<8x256xf32>
    %cst_34 = arith.constant 0xFF800000 : f32
    %110 = vector.shape_cast %22 : vector<1x256xi1> to vector<1x256xi1>
    %111 = vector.broadcast %110 : vector<1x256xi1> to vector<8x256xi1>
    %112 = vector.broadcast %cst_34 : f32 to vector<8x256xf32>
    %113 = arith.select %111, %105, %112 : vector<8x256xi1>, vector<8x256xf32>
    %114 = arith.maximumf %109, %113 : vector<8x256xf32>
    %115 = arith.maximumf %103, %114 : vector<8x256xf32>
    %c16_i32_35 = arith.constant 16 : i32
    %116 = tpu.dynamic_rotate %115 by %c16_i32_35 dim 1 : vector<8x256xf32>, i32 -> vector<8x256xf32>
    %c240_i32_36 = arith.constant 240 : i32
    %117 = tpu.dynamic_rotate %115 by %c240_i32_36 dim 1 : vector<8x256xf32>, i32 -> vector<8x256xf32>
    %cst_37 = arith.constant 0xFF800000 : f32
    %118 = vector.shape_cast %24 : vector<1x256xi1> to vector<1x256xi1>
    %119 = vector.broadcast %118 : vector<1x256xi1> to vector<8x256xi1>
    %120 = vector.broadcast %cst_37 : f32 to vector<8x256xf32>
    %121 = arith.select %119, %116, %120 : vector<8x256xi1>, vector<8x256xf32>
    %cst_38 = arith.constant 0xFF800000 : f32
    %122 = vector.shape_cast %26 : vector<1x256xi1> to vector<1x256xi1>
    %123 = vector.broadcast %122 : vector<1x256xi1> to vector<8x256xi1>
    %124 = vector.broadcast %cst_38 : f32 to vector<8x256xf32>
    %125 = arith.select %123, %117, %124 : vector<8x256xi1>, vector<8x256xf32>
    %126 = arith.maximumf %121, %125 : vector<8x256xf32>
    %127 = arith.maximumf %115, %126 : vector<8x256xf32>
    %128 = arith.subf %51, %127 : vector<8x256xf32>
    %cst_39 = arith.constant 0.000000e+00 : f32
    %129 = vector.broadcast %cst_39 : f32 to vector<8x256xf32>
    %130 = arith.maximumf %128, %129 : vector<8x256xf32>
    %131 = arith.mulf %78, %130 : vector<8x256xf32>
    %132 = arith.subf %130, %131 : vector<8x256xf32>
    %cst_40 = arith.constant 0.000000e+00 : f32
    %133 = vector.broadcast %cst_40 : f32 to vector<8x256xf32>
    %134 = arith.maximumf %132, %133 : vector<8x256xf32>
    %135 = arith.addf %78, %134 : vector<8x256xf32>
    %c16_i32_41 = arith.constant 16 : i32
    %136 = tpu.dynamic_rotate %103 by %c16_i32_41 dim 1 : vector<8x256xf32>, i32 -> vector<8x256xf32>
    %c240_i32_42 = arith.constant 240 : i32
    %137 = tpu.dynamic_rotate %103 by %c240_i32_42 dim 1 : vector<8x256xf32>, i32 -> vector<8x256xf32>
    %cst_43 = arith.constant 0x7F800000 : f32
    %138 = vector.shape_cast %24 : vector<1x256xi1> to vector<1x256xi1>
    %139 = vector.broadcast %138 : vector<1x256xi1> to vector<8x256xi1>
    %140 = vector.broadcast %cst_43 : f32 to vector<8x256xf32>
    %141 = arith.select %139, %136, %140 : vector<8x256xi1>, vector<8x256xf32>
    %cst_44 = arith.constant 0x7F800000 : f32
    %142 = vector.shape_cast %26 : vector<1x256xi1> to vector<1x256xi1>
    %143 = vector.broadcast %142 : vector<1x256xi1> to vector<8x256xi1>
    %144 = vector.broadcast %cst_44 : f32 to vector<8x256xf32>
    %145 = arith.select %143, %137, %144 : vector<8x256xi1>, vector<8x256xf32>
    %146 = arith.minimumf %141, %145 : vector<8x256xf32>
    %147 = arith.minimumf %103, %146 : vector<8x256xf32>
    %c1_i32_45 = arith.constant 1 : i32
    %148 = tpu.dynamic_rotate %103 by %c1_i32_45 dim 1 : vector<8x256xf32>, i32 -> vector<8x256xf32>
    %c255_i32_46 = arith.constant 255 : i32
    %149 = tpu.dynamic_rotate %103 by %c255_i32_46 dim 1 : vector<8x256xf32>, i32 -> vector<8x256xf32>
    %cst_47 = arith.constant 0x7F800000 : f32
    %150 = vector.shape_cast %20 : vector<1x256xi1> to vector<1x256xi1>
    %151 = vector.broadcast %150 : vector<1x256xi1> to vector<8x256xi1>
    %152 = vector.broadcast %cst_47 : f32 to vector<8x256xf32>
    %153 = arith.select %151, %148, %152 : vector<8x256xi1>, vector<8x256xf32>
    %cst_48 = arith.constant 0x7F800000 : f32
    %154 = vector.shape_cast %22 : vector<1x256xi1> to vector<1x256xi1>
    %155 = vector.broadcast %154 : vector<1x256xi1> to vector<8x256xi1>
    %156 = vector.broadcast %cst_48 : f32 to vector<8x256xf32>
    %157 = arith.select %155, %149, %156 : vector<8x256xi1>, vector<8x256xf32>
    %158 = arith.minimumf %153, %157 : vector<8x256xf32>
    %159 = arith.minimumf %103, %158 : vector<8x256xf32>
    %160 = arith.minimumf %147, %159 : vector<8x256xf32>
    %c1_i32_49 = arith.constant 1 : i32
    %161 = tpu.dynamic_rotate %160 by %c1_i32_49 dim 1 : vector<8x256xf32>, i32 -> vector<8x256xf32>
    %c255_i32_50 = arith.constant 255 : i32
    %162 = tpu.dynamic_rotate %160 by %c255_i32_50 dim 1 : vector<8x256xf32>, i32 -> vector<8x256xf32>
    %cst_51 = arith.constant 0xFF800000 : f32
    %163 = vector.shape_cast %20 : vector<1x256xi1> to vector<1x256xi1>
    %164 = vector.broadcast %163 : vector<1x256xi1> to vector<8x256xi1>
    %165 = vector.broadcast %cst_51 : f32 to vector<8x256xf32>
    %166 = arith.select %164, %161, %165 : vector<8x256xi1>, vector<8x256xf32>
    %cst_52 = arith.constant 0xFF800000 : f32
    %167 = vector.shape_cast %22 : vector<1x256xi1> to vector<1x256xi1>
    %168 = vector.broadcast %167 : vector<1x256xi1> to vector<8x256xi1>
    %169 = vector.broadcast %cst_52 : f32 to vector<8x256xf32>
    %170 = arith.select %168, %162, %169 : vector<8x256xi1>, vector<8x256xf32>
    %171 = arith.maximumf %166, %170 : vector<8x256xf32>
    %172 = arith.maximumf %160, %171 : vector<8x256xf32>
    %c16_i32_53 = arith.constant 16 : i32
    %173 = tpu.dynamic_rotate %172 by %c16_i32_53 dim 1 : vector<8x256xf32>, i32 -> vector<8x256xf32>
    %c240_i32_54 = arith.constant 240 : i32
    %174 = tpu.dynamic_rotate %172 by %c240_i32_54 dim 1 : vector<8x256xf32>, i32 -> vector<8x256xf32>
    %cst_55 = arith.constant 0xFF800000 : f32
    %175 = vector.shape_cast %24 : vector<1x256xi1> to vector<1x256xi1>
    %176 = vector.broadcast %175 : vector<1x256xi1> to vector<8x256xi1>
    %177 = vector.broadcast %cst_55 : f32 to vector<8x256xf32>
    %178 = arith.select %176, %173, %177 : vector<8x256xi1>, vector<8x256xf32>
    %cst_56 = arith.constant 0xFF800000 : f32
    %179 = vector.shape_cast %26 : vector<1x256xi1> to vector<1x256xi1>
    %180 = vector.broadcast %179 : vector<1x256xi1> to vector<8x256xi1>
    %181 = vector.broadcast %cst_56 : f32 to vector<8x256xf32>
    %182 = arith.select %180, %174, %181 : vector<8x256xi1>, vector<8x256xf32>
    %183 = arith.maximumf %178, %182 : vector<8x256xf32>
    %184 = arith.maximumf %172, %183 : vector<8x256xf32>
    %185 = arith.subf %103, %184 : vector<8x256xf32>
    %cst_57 = arith.constant 0.000000e+00 : f32
    %186 = vector.broadcast %cst_57 : f32 to vector<8x256xf32>
    %187 = arith.maximumf %185, %186 : vector<8x256xf32>
    %188 = arith.mulf %135, %187 : vector<8x256xf32>
    %189 = arith.subf %187, %188 : vector<8x256xf32>
    %cst_58 = arith.constant 0.000000e+00 : f32
    %190 = vector.broadcast %cst_58 : f32 to vector<8x256xf32>
    %191 = arith.maximumf %189, %190 : vector<8x256xf32>
    %192 = arith.addf %135, %191 : vector<8x256xf32>
    %c16_i32_59 = arith.constant 16 : i32
    %193 = tpu.dynamic_rotate %160 by %c16_i32_59 dim 1 : vector<8x256xf32>, i32 -> vector<8x256xf32>
    %c240_i32_60 = arith.constant 240 : i32
    %194 = tpu.dynamic_rotate %160 by %c240_i32_60 dim 1 : vector<8x256xf32>, i32 -> vector<8x256xf32>
    %cst_61 = arith.constant 0x7F800000 : f32
    %195 = vector.shape_cast %24 : vector<1x256xi1> to vector<1x256xi1>
    %196 = vector.broadcast %195 : vector<1x256xi1> to vector<8x256xi1>
    %197 = vector.broadcast %cst_61 : f32 to vector<8x256xf32>
    %198 = arith.select %196, %193, %197 : vector<8x256xi1>, vector<8x256xf32>
    %cst_62 = arith.constant 0x7F800000 : f32
    %199 = vector.shape_cast %26 : vector<1x256xi1> to vector<1x256xi1>
    %200 = vector.broadcast %199 : vector<1x256xi1> to vector<8x256xi1>
    %201 = vector.broadcast %cst_62 : f32 to vector<8x256xf32>
    %202 = arith.select %200, %194, %201 : vector<8x256xi1>, vector<8x256xf32>
    %203 = arith.minimumf %198, %202 : vector<8x256xf32>
    %204 = arith.minimumf %160, %203 : vector<8x256xf32>
    %c1_i32_63 = arith.constant 1 : i32
    %205 = tpu.dynamic_rotate %160 by %c1_i32_63 dim 1 : vector<8x256xf32>, i32 -> vector<8x256xf32>
    %c255_i32_64 = arith.constant 255 : i32
    %206 = tpu.dynamic_rotate %160 by %c255_i32_64 dim 1 : vector<8x256xf32>, i32 -> vector<8x256xf32>
    %cst_65 = arith.constant 0x7F800000 : f32
    %207 = vector.shape_cast %20 : vector<1x256xi1> to vector<1x256xi1>
    %208 = vector.broadcast %207 : vector<1x256xi1> to vector<8x256xi1>
    %209 = vector.broadcast %cst_65 : f32 to vector<8x256xf32>
    %210 = arith.select %208, %205, %209 : vector<8x256xi1>, vector<8x256xf32>
    %cst_66 = arith.constant 0x7F800000 : f32
    %211 = vector.shape_cast %22 : vector<1x256xi1> to vector<1x256xi1>
    %212 = vector.broadcast %211 : vector<1x256xi1> to vector<8x256xi1>
    %213 = vector.broadcast %cst_66 : f32 to vector<8x256xf32>
    %214 = arith.select %212, %206, %213 : vector<8x256xi1>, vector<8x256xf32>
    %215 = arith.minimumf %210, %214 : vector<8x256xf32>
    %216 = arith.minimumf %160, %215 : vector<8x256xf32>
    %217 = arith.minimumf %204, %216 : vector<8x256xf32>
    %c1_i32_67 = arith.constant 1 : i32
    %218 = tpu.dynamic_rotate %217 by %c1_i32_67 dim 1 : vector<8x256xf32>, i32 -> vector<8x256xf32>
    %c255_i32_68 = arith.constant 255 : i32
    %219 = tpu.dynamic_rotate %217 by %c255_i32_68 dim 1 : vector<8x256xf32>, i32 -> vector<8x256xf32>
    %cst_69 = arith.constant 0xFF800000 : f32
    %220 = vector.shape_cast %20 : vector<1x256xi1> to vector<1x256xi1>
    %221 = vector.broadcast %220 : vector<1x256xi1> to vector<8x256xi1>
    %222 = vector.broadcast %cst_69 : f32 to vector<8x256xf32>
    %223 = arith.select %221, %218, %222 : vector<8x256xi1>, vector<8x256xf32>
    %cst_70 = arith.constant 0xFF800000 : f32
    %224 = vector.shape_cast %22 : vector<1x256xi1> to vector<1x256xi1>
    %225 = vector.broadcast %224 : vector<1x256xi1> to vector<8x256xi1>
    %226 = vector.broadcast %cst_70 : f32 to vector<8x256xf32>
    %227 = arith.select %225, %219, %226 : vector<8x256xi1>, vector<8x256xf32>
    %228 = arith.maximumf %223, %227 : vector<8x256xf32>
    %229 = arith.maximumf %217, %228 : vector<8x256xf32>
    %c16_i32_71 = arith.constant 16 : i32
    %230 = tpu.dynamic_rotate %229 by %c16_i32_71 dim 1 : vector<8x256xf32>, i32 -> vector<8x256xf32>
    %c240_i32_72 = arith.constant 240 : i32
    %231 = tpu.dynamic_rotate %229 by %c240_i32_72 dim 1 : vector<8x256xf32>, i32 -> vector<8x256xf32>
    %cst_73 = arith.constant 0xFF800000 : f32
    %232 = vector.shape_cast %24 : vector<1x256xi1> to vector<1x256xi1>
    %233 = vector.broadcast %232 : vector<1x256xi1> to vector<8x256xi1>
    %234 = vector.broadcast %cst_73 : f32 to vector<8x256xf32>
    %235 = arith.select %233, %230, %234 : vector<8x256xi1>, vector<8x256xf32>
    %cst_74 = arith.constant 0xFF800000 : f32
    %236 = vector.shape_cast %26 : vector<1x256xi1> to vector<1x256xi1>
    %237 = vector.broadcast %236 : vector<1x256xi1> to vector<8x256xi1>
    %238 = vector.broadcast %cst_74 : f32 to vector<8x256xf32>
    %239 = arith.select %237, %231, %238 : vector<8x256xi1>, vector<8x256xf32>
    %240 = arith.maximumf %235, %239 : vector<8x256xf32>
    %241 = arith.maximumf %229, %240 : vector<8x256xf32>
    %242 = arith.subf %160, %241 : vector<8x256xf32>
    %cst_75 = arith.constant 0.000000e+00 : f32
    %243 = vector.broadcast %cst_75 : f32 to vector<8x256xf32>
    %244 = arith.maximumf %242, %243 : vector<8x256xf32>
    %245 = arith.mulf %192, %244 : vector<8x256xf32>
    %246 = arith.subf %244, %245 : vector<8x256xf32>
    %cst_76 = arith.constant 0.000000e+00 : f32
    %247 = vector.broadcast %cst_76 : f32 to vector<8x256xf32>
    %248 = arith.maximumf %246, %247 : vector<8x256xf32>
    %249 = arith.addf %192, %248 : vector<8x256xf32>
    %c16_i32_77 = arith.constant 16 : i32
    %250 = tpu.dynamic_rotate %0 by %c16_i32_77 dim 1 : vector<8x256xf32>, i32 -> vector<8x256xf32>
    %c240_i32_78 = arith.constant 240 : i32
    %251 = tpu.dynamic_rotate %0 by %c240_i32_78 dim 1 : vector<8x256xf32>, i32 -> vector<8x256xf32>
    %cst_79 = arith.constant 0x7F800000 : f32
    %252 = vector.shape_cast %24 : vector<1x256xi1> to vector<1x256xi1>
    %253 = vector.broadcast %252 : vector<1x256xi1> to vector<8x256xi1>
    %254 = vector.broadcast %cst_79 : f32 to vector<8x256xf32>
    %255 = arith.select %253, %250, %254 : vector<8x256xi1>, vector<8x256xf32>
    %cst_80 = arith.constant 0x7F800000 : f32
    %256 = vector.shape_cast %26 : vector<1x256xi1> to vector<1x256xi1>
    %257 = vector.broadcast %256 : vector<1x256xi1> to vector<8x256xi1>
    %258 = vector.broadcast %cst_80 : f32 to vector<8x256xf32>
    %259 = arith.select %257, %251, %258 : vector<8x256xi1>, vector<8x256xf32>
    %260 = arith.minimumf %255, %259 : vector<8x256xf32>
    %261 = arith.minimumf %0, %260 : vector<8x256xf32>
    %c1_i32_81 = arith.constant 1 : i32
    %262 = tpu.dynamic_rotate %0 by %c1_i32_81 dim 1 : vector<8x256xf32>, i32 -> vector<8x256xf32>
    %c255_i32_82 = arith.constant 255 : i32
    %263 = tpu.dynamic_rotate %0 by %c255_i32_82 dim 1 : vector<8x256xf32>, i32 -> vector<8x256xf32>
    %cst_83 = arith.constant 0x7F800000 : f32
    %264 = vector.shape_cast %20 : vector<1x256xi1> to vector<1x256xi1>
    %265 = vector.broadcast %264 : vector<1x256xi1> to vector<8x256xi1>
    %266 = vector.broadcast %cst_83 : f32 to vector<8x256xf32>
    %267 = arith.select %265, %262, %266 : vector<8x256xi1>, vector<8x256xf32>
    %cst_84 = arith.constant 0x7F800000 : f32
    %268 = vector.shape_cast %22 : vector<1x256xi1> to vector<1x256xi1>
    %269 = vector.broadcast %268 : vector<1x256xi1> to vector<8x256xi1>
    %270 = vector.broadcast %cst_84 : f32 to vector<8x256xf32>
    %271 = arith.select %269, %263, %270 : vector<8x256xi1>, vector<8x256xf32>
    %272 = arith.minimumf %267, %271 : vector<8x256xf32>
    %273 = arith.minimumf %0, %272 : vector<8x256xf32>
    %274 = arith.minimumf %261, %273 : vector<8x256xf32>
    %c1_i32_85 = arith.constant 1 : i32
    %275 = tpu.dynamic_rotate %274 by %c1_i32_85 dim 1 : vector<8x256xf32>, i32 -> vector<8x256xf32>
    %c255_i32_86 = arith.constant 255 : i32
    %276 = tpu.dynamic_rotate %274 by %c255_i32_86 dim 1 : vector<8x256xf32>, i32 -> vector<8x256xf32>
    %cst_87 = arith.constant 0xFF800000 : f32
    %277 = vector.shape_cast %20 : vector<1x256xi1> to vector<1x256xi1>
    %278 = vector.broadcast %277 : vector<1x256xi1> to vector<8x256xi1>
    %279 = vector.broadcast %cst_87 : f32 to vector<8x256xf32>
    %280 = arith.select %278, %275, %279 : vector<8x256xi1>, vector<8x256xf32>
    %cst_88 = arith.constant 0xFF800000 : f32
    %281 = vector.shape_cast %22 : vector<1x256xi1> to vector<1x256xi1>
    %282 = vector.broadcast %281 : vector<1x256xi1> to vector<8x256xi1>
    %283 = vector.broadcast %cst_88 : f32 to vector<8x256xf32>
    %284 = arith.select %282, %276, %283 : vector<8x256xi1>, vector<8x256xf32>
    %285 = arith.maximumf %280, %284 : vector<8x256xf32>
    %286 = arith.maximumf %274, %285 : vector<8x256xf32>
    %c16_i32_89 = arith.constant 16 : i32
    %287 = tpu.dynamic_rotate %286 by %c16_i32_89 dim 1 : vector<8x256xf32>, i32 -> vector<8x256xf32>
    %c240_i32_90 = arith.constant 240 : i32
    %288 = tpu.dynamic_rotate %286 by %c240_i32_90 dim 1 : vector<8x256xf32>, i32 -> vector<8x256xf32>
    %cst_91 = arith.constant 0xFF800000 : f32
    %289 = vector.shape_cast %24 : vector<1x256xi1> to vector<1x256xi1>
    %290 = vector.broadcast %289 : vector<1x256xi1> to vector<8x256xi1>
    %291 = vector.broadcast %cst_91 : f32 to vector<8x256xf32>
    %292 = arith.select %290, %287, %291 : vector<8x256xi1>, vector<8x256xf32>
    %cst_92 = arith.constant 0xFF800000 : f32
    %293 = vector.shape_cast %26 : vector<1x256xi1> to vector<1x256xi1>
    %294 = vector.broadcast %293 : vector<1x256xi1> to vector<8x256xi1>
    %295 = vector.broadcast %cst_92 : f32 to vector<8x256xf32>
    %296 = arith.select %294, %288, %295 : vector<8x256xi1>, vector<8x256xf32>
    %297 = arith.maximumf %292, %296 : vector<8x256xf32>
    %298 = arith.maximumf %286, %297 : vector<8x256xf32>
    %299 = arith.subf %0, %298 : vector<8x256xf32>
    %cst_93 = arith.constant 0.000000e+00 : f32
    %300 = vector.broadcast %cst_93 : f32 to vector<8x256xf32>
    %301 = arith.maximumf %299, %300 : vector<8x256xf32>
    %c16_i32_94 = arith.constant 16 : i32
    %302 = tpu.dynamic_rotate %274 by %c16_i32_94 dim 1 : vector<8x256xf32>, i32 -> vector<8x256xf32>
    %c240_i32_95 = arith.constant 240 : i32
    %303 = tpu.dynamic_rotate %274 by %c240_i32_95 dim 1 : vector<8x256xf32>, i32 -> vector<8x256xf32>
    %cst_96 = arith.constant 0x7F800000 : f32
    %304 = vector.shape_cast %24 : vector<1x256xi1> to vector<1x256xi1>
    %305 = vector.broadcast %304 : vector<1x256xi1> to vector<8x256xi1>
    %306 = vector.broadcast %cst_96 : f32 to vector<8x256xf32>
    %307 = arith.select %305, %302, %306 : vector<8x256xi1>, vector<8x256xf32>
    %cst_97 = arith.constant 0x7F800000 : f32
    %308 = vector.shape_cast %26 : vector<1x256xi1> to vector<1x256xi1>
    %309 = vector.broadcast %308 : vector<1x256xi1> to vector<8x256xi1>
    %310 = vector.broadcast %cst_97 : f32 to vector<8x256xf32>
    %311 = arith.select %309, %303, %310 : vector<8x256xi1>, vector<8x256xf32>
    %312 = arith.minimumf %307, %311 : vector<8x256xf32>
    %313 = arith.minimumf %274, %312 : vector<8x256xf32>
    %c1_i32_98 = arith.constant 1 : i32
    %314 = tpu.dynamic_rotate %274 by %c1_i32_98 dim 1 : vector<8x256xf32>, i32 -> vector<8x256xf32>
    %c255_i32_99 = arith.constant 255 : i32
    %315 = tpu.dynamic_rotate %274 by %c255_i32_99 dim 1 : vector<8x256xf32>, i32 -> vector<8x256xf32>
    %cst_100 = arith.constant 0x7F800000 : f32
    %316 = vector.shape_cast %20 : vector<1x256xi1> to vector<1x256xi1>
    %317 = vector.broadcast %316 : vector<1x256xi1> to vector<8x256xi1>
    %318 = vector.broadcast %cst_100 : f32 to vector<8x256xf32>
    %319 = arith.select %317, %314, %318 : vector<8x256xi1>, vector<8x256xf32>
    %cst_101 = arith.constant 0x7F800000 : f32
    %320 = vector.shape_cast %22 : vector<1x256xi1> to vector<1x256xi1>
    %321 = vector.broadcast %320 : vector<1x256xi1> to vector<8x256xi1>
    %322 = vector.broadcast %cst_101 : f32 to vector<8x256xf32>
    %323 = arith.select %321, %315, %322 : vector<8x256xi1>, vector<8x256xf32>
    %324 = arith.minimumf %319, %323 : vector<8x256xf32>
    %325 = arith.minimumf %274, %324 : vector<8x256xf32>
    %326 = arith.minimumf %313, %325 : vector<8x256xf32>
    %c1_i32_102 = arith.constant 1 : i32
    %327 = tpu.dynamic_rotate %326 by %c1_i32_102 dim 1 : vector<8x256xf32>, i32 -> vector<8x256xf32>
    %c255_i32_103 = arith.constant 255 : i32
    %328 = tpu.dynamic_rotate %326 by %c255_i32_103 dim 1 : vector<8x256xf32>, i32 -> vector<8x256xf32>
    %cst_104 = arith.constant 0xFF800000 : f32
    %329 = vector.shape_cast %20 : vector<1x256xi1> to vector<1x256xi1>
    %330 = vector.broadcast %329 : vector<1x256xi1> to vector<8x256xi1>
    %331 = vector.broadcast %cst_104 : f32 to vector<8x256xf32>
    %332 = arith.select %330, %327, %331 : vector<8x256xi1>, vector<8x256xf32>
    %cst_105 = arith.constant 0xFF800000 : f32
    %333 = vector.shape_cast %22 : vector<1x256xi1> to vector<1x256xi1>
    %334 = vector.broadcast %333 : vector<1x256xi1> to vector<8x256xi1>
    %335 = vector.broadcast %cst_105 : f32 to vector<8x256xf32>
    %336 = arith.select %334, %328, %335 : vector<8x256xi1>, vector<8x256xf32>
    %337 = arith.maximumf %332, %336 : vector<8x256xf32>
    %338 = arith.maximumf %326, %337 : vector<8x256xf32>
    %c16_i32_106 = arith.constant 16 : i32
    %339 = tpu.dynamic_rotate %338 by %c16_i32_106 dim 1 : vector<8x256xf32>, i32 -> vector<8x256xf32>
    %c240_i32_107 = arith.constant 240 : i32
    %340 = tpu.dynamic_rotate %338 by %c240_i32_107 dim 1 : vector<8x256xf32>, i32 -> vector<8x256xf32>
    %cst_108 = arith.constant 0xFF800000 : f32
    %341 = vector.shape_cast %24 : vector<1x256xi1> to vector<1x256xi1>
    %342 = vector.broadcast %341 : vector<1x256xi1> to vector<8x256xi1>
    %343 = vector.broadcast %cst_108 : f32 to vector<8x256xf32>
    %344 = arith.select %342, %339, %343 : vector<8x256xi1>, vector<8x256xf32>
    %cst_109 = arith.constant 0xFF800000 : f32
    %345 = vector.shape_cast %26 : vector<1x256xi1> to vector<1x256xi1>
    %346 = vector.broadcast %345 : vector<1x256xi1> to vector<8x256xi1>
    %347 = vector.broadcast %cst_109 : f32 to vector<8x256xf32>
    %348 = arith.select %346, %340, %347 : vector<8x256xi1>, vector<8x256xf32>
    %349 = arith.maximumf %344, %348 : vector<8x256xf32>
    %350 = arith.maximumf %338, %349 : vector<8x256xf32>
    %351 = arith.subf %274, %350 : vector<8x256xf32>
    %cst_110 = arith.constant 0.000000e+00 : f32
    %352 = vector.broadcast %cst_110 : f32 to vector<8x256xf32>
    %353 = arith.maximumf %351, %352 : vector<8x256xf32>
    %354 = arith.mulf %301, %353 : vector<8x256xf32>
    %355 = arith.subf %353, %354 : vector<8x256xf32>
    %cst_111 = arith.constant 0.000000e+00 : f32
    %356 = vector.broadcast %cst_111 : f32 to vector<8x256xf32>
    %357 = arith.maximumf %355, %356 : vector<8x256xf32>
    %358 = arith.addf %301, %357 : vector<8x256xf32>
    %c16_i32_112 = arith.constant 16 : i32
    %359 = tpu.dynamic_rotate %326 by %c16_i32_112 dim 1 : vector<8x256xf32>, i32 -> vector<8x256xf32>
    %c240_i32_113 = arith.constant 240 : i32
    %360 = tpu.dynamic_rotate %326 by %c240_i32_113 dim 1 : vector<8x256xf32>, i32 -> vector<8x256xf32>
    %cst_114 = arith.constant 0x7F800000 : f32
    %361 = vector.shape_cast %24 : vector<1x256xi1> to vector<1x256xi1>
    %362 = vector.broadcast %361 : vector<1x256xi1> to vector<8x256xi1>
    %363 = vector.broadcast %cst_114 : f32 to vector<8x256xf32>
    %364 = arith.select %362, %359, %363 : vector<8x256xi1>, vector<8x256xf32>
    %cst_115 = arith.constant 0x7F800000 : f32
    %365 = vector.shape_cast %26 : vector<1x256xi1> to vector<1x256xi1>
    %366 = vector.broadcast %365 : vector<1x256xi1> to vector<8x256xi1>
    %367 = vector.broadcast %cst_115 : f32 to vector<8x256xf32>
    %368 = arith.select %366, %360, %367 : vector<8x256xi1>, vector<8x256xf32>
    %369 = arith.minimumf %364, %368 : vector<8x256xf32>
    %370 = arith.minimumf %326, %369 : vector<8x256xf32>
    %c1_i32_116 = arith.constant 1 : i32
    %371 = tpu.dynamic_rotate %326 by %c1_i32_116 dim 1 : vector<8x256xf32>, i32 -> vector<8x256xf32>
    %c255_i32_117 = arith.constant 255 : i32
    %372 = tpu.dynamic_rotate %326 by %c255_i32_117 dim 1 : vector<8x256xf32>, i32 -> vector<8x256xf32>
    %cst_118 = arith.constant 0x7F800000 : f32
    %373 = vector.shape_cast %20 : vector<1x256xi1> to vector<1x256xi1>
    %374 = vector.broadcast %373 : vector<1x256xi1> to vector<8x256xi1>
    %375 = vector.broadcast %cst_118 : f32 to vector<8x256xf32>
    %376 = arith.select %374, %371, %375 : vector<8x256xi1>, vector<8x256xf32>
    %cst_119 = arith.constant 0x7F800000 : f32
    %377 = vector.shape_cast %22 : vector<1x256xi1> to vector<1x256xi1>
    %378 = vector.broadcast %377 : vector<1x256xi1> to vector<8x256xi1>
    %379 = vector.broadcast %cst_119 : f32 to vector<8x256xf32>
    %380 = arith.select %378, %372, %379 : vector<8x256xi1>, vector<8x256xf32>
    %381 = arith.minimumf %376, %380 : vector<8x256xf32>
    %382 = arith.minimumf %326, %381 : vector<8x256xf32>
    %383 = arith.minimumf %370, %382 : vector<8x256xf32>
    %c1_i32_120 = arith.constant 1 : i32
    %384 = tpu.dynamic_rotate %383 by %c1_i32_120 dim 1 : vector<8x256xf32>, i32 -> vector<8x256xf32>
    %c255_i32_121 = arith.constant 255 : i32
    %385 = tpu.dynamic_rotate %383 by %c255_i32_121 dim 1 : vector<8x256xf32>, i32 -> vector<8x256xf32>
    %cst_122 = arith.constant 0xFF800000 : f32
    %386 = vector.shape_cast %20 : vector<1x256xi1> to vector<1x256xi1>
    %387 = vector.broadcast %386 : vector<1x256xi1> to vector<8x256xi1>
    %388 = vector.broadcast %cst_122 : f32 to vector<8x256xf32>
    %389 = arith.select %387, %384, %388 : vector<8x256xi1>, vector<8x256xf32>
    %cst_123 = arith.constant 0xFF800000 : f32
    %390 = vector.shape_cast %22 : vector<1x256xi1> to vector<1x256xi1>
    %391 = vector.broadcast %390 : vector<1x256xi1> to vector<8x256xi1>
    %392 = vector.broadcast %cst_123 : f32 to vector<8x256xf32>
    %393 = arith.select %391, %385, %392 : vector<8x256xi1>, vector<8x256xf32>
    %394 = arith.maximumf %389, %393 : vector<8x256xf32>
    %395 = arith.maximumf %383, %394 : vector<8x256xf32>
    %c16_i32_124 = arith.constant 16 : i32
    %396 = tpu.dynamic_rotate %395 by %c16_i32_124 dim 1 : vector<8x256xf32>, i32 -> vector<8x256xf32>
    %c240_i32_125 = arith.constant 240 : i32
    %397 = tpu.dynamic_rotate %395 by %c240_i32_125 dim 1 : vector<8x256xf32>, i32 -> vector<8x256xf32>
    %cst_126 = arith.constant 0xFF800000 : f32
    %398 = vector.shape_cast %24 : vector<1x256xi1> to vector<1x256xi1>
    %399 = vector.broadcast %398 : vector<1x256xi1> to vector<8x256xi1>
    %400 = vector.broadcast %cst_126 : f32 to vector<8x256xf32>
    %401 = arith.select %399, %396, %400 : vector<8x256xi1>, vector<8x256xf32>
    %cst_127 = arith.constant 0xFF800000 : f32
    %402 = vector.shape_cast %26 : vector<1x256xi1> to vector<1x256xi1>
    %403 = vector.broadcast %402 : vector<1x256xi1> to vector<8x256xi1>
    %404 = vector.broadcast %cst_127 : f32 to vector<8x256xf32>
    %405 = arith.select %403, %397, %404 : vector<8x256xi1>, vector<8x256xf32>
    %406 = arith.maximumf %401, %405 : vector<8x256xf32>
    %407 = arith.maximumf %395, %406 : vector<8x256xf32>
    %408 = arith.subf %326, %407 : vector<8x256xf32>
    %cst_128 = arith.constant 0.000000e+00 : f32
    %409 = vector.broadcast %cst_128 : f32 to vector<8x256xf32>
    %410 = arith.maximumf %408, %409 : vector<8x256xf32>
    %411 = arith.mulf %358, %410 : vector<8x256xf32>
    %412 = arith.subf %410, %411 : vector<8x256xf32>
    %cst_129 = arith.constant 0.000000e+00 : f32
    %413 = vector.broadcast %cst_129 : f32 to vector<8x256xf32>
    %414 = arith.maximumf %412, %413 : vector<8x256xf32>
    %415 = arith.addf %358, %414 : vector<8x256xf32>
    %c16_i32_130 = arith.constant 16 : i32
    %416 = tpu.dynamic_rotate %383 by %c16_i32_130 dim 1 : vector<8x256xf32>, i32 -> vector<8x256xf32>
    %c240_i32_131 = arith.constant 240 : i32
    %417 = tpu.dynamic_rotate %383 by %c240_i32_131 dim 1 : vector<8x256xf32>, i32 -> vector<8x256xf32>
    %cst_132 = arith.constant 0x7F800000 : f32
    %418 = vector.shape_cast %24 : vector<1x256xi1> to vector<1x256xi1>
    %419 = vector.broadcast %418 : vector<1x256xi1> to vector<8x256xi1>
    %420 = vector.broadcast %cst_132 : f32 to vector<8x256xf32>
    %421 = arith.select %419, %416, %420 : vector<8x256xi1>, vector<8x256xf32>
    %cst_133 = arith.constant 0x7F800000 : f32
    %422 = vector.shape_cast %26 : vector<1x256xi1> to vector<1x256xi1>
    %423 = vector.broadcast %422 : vector<1x256xi1> to vector<8x256xi1>
    %424 = vector.broadcast %cst_133 : f32 to vector<8x256xf32>
    %425 = arith.select %423, %417, %424 : vector<8x256xi1>, vector<8x256xf32>
    %426 = arith.minimumf %421, %425 : vector<8x256xf32>
    %427 = arith.minimumf %383, %426 : vector<8x256xf32>
    %c1_i32_134 = arith.constant 1 : i32
    %428 = tpu.dynamic_rotate %383 by %c1_i32_134 dim 1 : vector<8x256xf32>, i32 -> vector<8x256xf32>
    %c255_i32_135 = arith.constant 255 : i32
    %429 = tpu.dynamic_rotate %383 by %c255_i32_135 dim 1 : vector<8x256xf32>, i32 -> vector<8x256xf32>
    %cst_136 = arith.constant 0x7F800000 : f32
    %430 = vector.shape_cast %20 : vector<1x256xi1> to vector<1x256xi1>
    %431 = vector.broadcast %430 : vector<1x256xi1> to vector<8x256xi1>
    %432 = vector.broadcast %cst_136 : f32 to vector<8x256xf32>
    %433 = arith.select %431, %428, %432 : vector<8x256xi1>, vector<8x256xf32>
    %cst_137 = arith.constant 0x7F800000 : f32
    %434 = vector.shape_cast %22 : vector<1x256xi1> to vector<1x256xi1>
    %435 = vector.broadcast %434 : vector<1x256xi1> to vector<8x256xi1>
    %436 = vector.broadcast %cst_137 : f32 to vector<8x256xf32>
    %437 = arith.select %435, %429, %436 : vector<8x256xi1>, vector<8x256xf32>
    %438 = arith.minimumf %433, %437 : vector<8x256xf32>
    %439 = arith.minimumf %383, %438 : vector<8x256xf32>
    %440 = arith.minimumf %427, %439 : vector<8x256xf32>
    %c1_i32_138 = arith.constant 1 : i32
    %441 = tpu.dynamic_rotate %440 by %c1_i32_138 dim 1 : vector<8x256xf32>, i32 -> vector<8x256xf32>
    %c255_i32_139 = arith.constant 255 : i32
    %442 = tpu.dynamic_rotate %440 by %c255_i32_139 dim 1 : vector<8x256xf32>, i32 -> vector<8x256xf32>
    %cst_140 = arith.constant 0xFF800000 : f32
    %443 = vector.shape_cast %20 : vector<1x256xi1> to vector<1x256xi1>
    %444 = vector.broadcast %443 : vector<1x256xi1> to vector<8x256xi1>
    %445 = vector.broadcast %cst_140 : f32 to vector<8x256xf32>
    %446 = arith.select %444, %441, %445 : vector<8x256xi1>, vector<8x256xf32>
    %cst_141 = arith.constant 0xFF800000 : f32
    %447 = vector.shape_cast %22 : vector<1x256xi1> to vector<1x256xi1>
    %448 = vector.broadcast %447 : vector<1x256xi1> to vector<8x256xi1>
    %449 = vector.broadcast %cst_141 : f32 to vector<8x256xf32>
    %450 = arith.select %448, %442, %449 : vector<8x256xi1>, vector<8x256xf32>
    %451 = arith.maximumf %446, %450 : vector<8x256xf32>
    %452 = arith.maximumf %440, %451 : vector<8x256xf32>
    %c16_i32_142 = arith.constant 16 : i32
    %453 = tpu.dynamic_rotate %452 by %c16_i32_142 dim 1 : vector<8x256xf32>, i32 -> vector<8x256xf32>
    %c240_i32_143 = arith.constant 240 : i32
    %454 = tpu.dynamic_rotate %452 by %c240_i32_143 dim 1 : vector<8x256xf32>, i32 -> vector<8x256xf32>
    %cst_144 = arith.constant 0xFF800000 : f32
    %455 = vector.shape_cast %24 : vector<1x256xi1> to vector<1x256xi1>
    %456 = vector.broadcast %455 : vector<1x256xi1> to vector<8x256xi1>
    %457 = vector.broadcast %cst_144 : f32 to vector<8x256xf32>
    %458 = arith.select %456, %453, %457 : vector<8x256xi1>, vector<8x256xf32>
    %cst_145 = arith.constant 0xFF800000 : f32
    %459 = vector.shape_cast %26 : vector<1x256xi1> to vector<1x256xi1>
    %460 = vector.broadcast %459 : vector<1x256xi1> to vector<8x256xi1>
    %461 = vector.broadcast %cst_145 : f32 to vector<8x256xf32>
    %462 = arith.select %460, %454, %461 : vector<8x256xi1>, vector<8x256xf32>
    %463 = arith.maximumf %458, %462 : vector<8x256xf32>
    %464 = arith.maximumf %452, %463 : vector<8x256xf32>
    %465 = arith.subf %383, %464 : vector<8x256xf32>
    %cst_146 = arith.constant 0.000000e+00 : f32
    %466 = vector.broadcast %cst_146 : f32 to vector<8x256xf32>
    %467 = arith.maximumf %465, %466 : vector<8x256xf32>
    %468 = arith.mulf %415, %467 : vector<8x256xf32>
    %469 = arith.subf %467, %468 : vector<8x256xf32>
    %cst_147 = arith.constant 0.000000e+00 : f32
    %470 = vector.broadcast %cst_147 : f32 to vector<8x256xf32>
    %471 = arith.maximumf %469, %470 : vector<8x256xf32>
    %472 = arith.addf %415, %471 : vector<8x256xf32>
    %473 = arith.mulf %0, %1 : vector<8x256xf32>
    %474 = vector.shape_cast %473 : vector<8x256xf32> to vector<1x8x256xf32>
    %cst_148 = arith.constant dense<0.000000e+00> : vector<1xf32>
    %475 = vector.multi_reduction <add>, %474, %cst_148 [1, 2] : vector<1x8x256xf32> to vector<1xf32>
    %476 = vector.shape_cast %475 : vector<1xf32> to vector<1x1x1xf32>
    %477 = vector.extract %476[0, 0, 0] : f32 from vector<1x1x1xf32>
    %478 = vector.shape_cast %0 : vector<8x256xf32> to vector<1x8x256xf32>
    %cst_149 = arith.constant dense<0.000000e+00> : vector<1xf32>
    %479 = vector.multi_reduction <add>, %478, %cst_149 [1, 2] : vector<1x8x256xf32> to vector<1xf32>
    %480 = vector.shape_cast %479 : vector<1xf32> to vector<1x1x1xf32>
    %481 = vector.extract %480[0, 0, 0] : f32 from vector<1x1x1xf32>
    %482 = vector.shape_cast %1 : vector<8x256xf32> to vector<1x8x256xf32>
    %cst_150 = arith.constant dense<0.000000e+00> : vector<1xf32>
    %483 = vector.multi_reduction <add>, %482, %cst_150 [1, 2] : vector<1x8x256xf32> to vector<1xf32>
    %484 = vector.shape_cast %483 : vector<1xf32> to vector<1x1x1xf32>
    %485 = vector.extract %484[0, 0, 0] : f32 from vector<1x1x1xf32>
    %486 = arith.mulf %249, %0 : vector<8x256xf32>
    %487 = vector.shape_cast %486 : vector<8x256xf32> to vector<1x8x256xf32>
    %cst_151 = arith.constant dense<0.000000e+00> : vector<1xf32>
    %488 = vector.multi_reduction <add>, %487, %cst_151 [1, 2] : vector<1x8x256xf32> to vector<1xf32>
    %489 = vector.shape_cast %488 : vector<1xf32> to vector<1x1x1xf32>
    %490 = vector.extract %489[0, 0, 0] : f32 from vector<1x1x1xf32>
    %491 = vector.shape_cast %249 : vector<8x256xf32> to vector<1x8x256xf32>
    %cst_152 = arith.constant dense<0.000000e+00> : vector<1xf32>
    %492 = vector.multi_reduction <add>, %491, %cst_152 [1, 2] : vector<1x8x256xf32> to vector<1xf32>
    %493 = vector.shape_cast %492 : vector<1xf32> to vector<1x1x1xf32>
    %494 = vector.extract %493[0, 0, 0] : f32 from vector<1x1x1xf32>
    %495 = arith.mulf %472, %1 : vector<8x256xf32>
    %496 = vector.shape_cast %495 : vector<8x256xf32> to vector<1x8x256xf32>
    %cst_153 = arith.constant dense<0.000000e+00> : vector<1xf32>
    %497 = vector.multi_reduction <add>, %496, %cst_153 [1, 2] : vector<1x8x256xf32> to vector<1xf32>
    %498 = vector.shape_cast %497 : vector<1xf32> to vector<1x1x1xf32>
    %499 = vector.extract %498[0, 0, 0] : f32 from vector<1x1x1xf32>
    %500 = vector.shape_cast %472 : vector<8x256xf32> to vector<1x8x256xf32>
    %cst_154 = arith.constant dense<0.000000e+00> : vector<1xf32>
    %501 = vector.multi_reduction <add>, %500, %cst_154 [1, 2] : vector<1x8x256xf32> to vector<1xf32>
    %502 = vector.shape_cast %501 : vector<1xf32> to vector<1x1x1xf32>
    %503 = vector.extract %502[0, 0, 0] : f32 from vector<1x1x1xf32>
    %504 = tpu.iota {dimensions = array<i32: 2>} : vector<1x8x128xi32>
    %cst_155 = arith.constant 0.000000e+00 : f32
    %505 = vector.broadcast %cst_155 : f32 to vector<1x8x128xf32>
    %c0_i32_156 = arith.constant 0 : i32
    %506 = vector.broadcast %c0_i32_156 : i32 to vector<1x8x128xi32>
    %507 = arith.cmpi eq, %504, %506 : vector<1x8x128xi32>
    %508 = vector.broadcast %477 : f32 to vector<1x8x128xf32>
    %509 = arith.select %507, %508, %505 : vector<1x8x128xi1>, vector<1x8x128xf32>
    %c1_i32_157 = arith.constant 1 : i32
    %510 = vector.broadcast %c1_i32_157 : i32 to vector<1x8x128xi32>
    %511 = arith.cmpi eq, %504, %510 : vector<1x8x128xi32>
    %512 = vector.broadcast %481 : f32 to vector<1x8x128xf32>
    %513 = arith.select %511, %512, %509 : vector<1x8x128xi1>, vector<1x8x128xf32>
    %c2_i32 = arith.constant 2 : i32
    %514 = vector.broadcast %c2_i32 : i32 to vector<1x8x128xi32>
    %515 = arith.cmpi eq, %504, %514 : vector<1x8x128xi32>
    %516 = vector.broadcast %485 : f32 to vector<1x8x128xf32>
    %517 = arith.select %515, %516, %513 : vector<1x8x128xi1>, vector<1x8x128xf32>
    %c3_i32 = arith.constant 3 : i32
    %518 = vector.broadcast %c3_i32 : i32 to vector<1x8x128xi32>
    %519 = arith.cmpi eq, %504, %518 : vector<1x8x128xi32>
    %520 = vector.broadcast %490 : f32 to vector<1x8x128xf32>
    %521 = arith.select %519, %520, %517 : vector<1x8x128xi1>, vector<1x8x128xf32>
    %c4_i32 = arith.constant 4 : i32
    %522 = vector.broadcast %c4_i32 : i32 to vector<1x8x128xi32>
    %523 = arith.cmpi eq, %504, %522 : vector<1x8x128xi32>
    %524 = vector.broadcast %494 : f32 to vector<1x8x128xf32>
    %525 = arith.select %523, %524, %521 : vector<1x8x128xi1>, vector<1x8x128xf32>
    %c5_i32 = arith.constant 5 : i32
    %526 = vector.broadcast %c5_i32 : i32 to vector<1x8x128xi32>
    %527 = arith.cmpi eq, %504, %526 : vector<1x8x128xi32>
    %528 = vector.broadcast %499 : f32 to vector<1x8x128xf32>
    %529 = arith.select %527, %528, %525 : vector<1x8x128xi1>, vector<1x8x128xf32>
    %c6_i32 = arith.constant 6 : i32
    %530 = vector.broadcast %c6_i32 : i32 to vector<1x8x128xi32>
    %531 = arith.cmpi eq, %504, %530 : vector<1x8x128xi32>
    %532 = vector.broadcast %503 : f32 to vector<1x8x128xf32>
    %533 = arith.select %531, %532, %529 : vector<1x8x128xi1>, vector<1x8x128xf32>
    %c0_158 = arith.constant 0 : index
    %c0_159 = arith.constant 0 : index
    %c0_160 = arith.constant 0 : index
    %534 = vector.load %arg3[%c0_158, %c0_159, %c0_160] : memref<1x8x128xf32, #tpu.memory_space<vmem>>, vector<1x8x128xf32>
    tpu.vector_store %arg3[%c0_158, %c0_159, %c0_160], %533 {strides = array<i32>} : memref<1x8x128xf32, #tpu.memory_space<vmem>>, vector<1x8x128xf32>,
    return
  }
  func.func @transform_0(%arg0: i32) -> (i32, i32) {
    %c0_i32 = arith.constant 0 : i32
    %c0_i32_0 = arith.constant 0 : i32
    return %arg0, %c0_i32 : i32, i32
  }
  func.func @transform_1(%arg0: i32) -> (i32, i32) {
    %c0_i32 = arith.constant 0 : i32
    %c0_i32_0 = arith.constant 0 : i32
    return %arg0, %c0_i32 : i32, i32
  }
  func.func @transform_2(%arg0: i32) -> (i32, i32, i32) {
    %c0_i32 = arith.constant 0 : i32
    %c0_i32_0 = arith.constant 0 : i32
    %c0_i32_1 = arith.constant 0 : i32
    return %arg0, %c0_i32, %c0_i32_0 : i32, i32, i32
  }
}

</mosaic_0001>

<bundles_post_ra>
// kernel: tpu_custom_call.1
= control target key start
LH: loop header
LB: loop body
LE: loop exit
PB: predicated region body
PF: predicated region fallthrough
CT: control target
= control target key end

     0   :  { %7 = vsyncpa [#allocation3], 0  ;;  %s1898_s0 = inlined_call_operand.hbm [shape: f32[8,256], index: 0, kind: input, shape index: {}]   ;;  %s1899_s1 = inlined_call_operand.hbm [shape: f32[8,256], index: 1, kind: input, shape index: {}]   ;;  %s1900_s2 = inlined_call_operand.hbm [shape: f32[1,8,128], index: 2, kind: output, shape index: {}]  }
   0x1   :  { %8 = vsyncpa [#allocation6], 0 }
   0x2   :  { %9 = vsyncpa [#allocation4], 0  ;;  %s970_s9 = smov [#allocation2]   ;;  %s971_s11 = smov [#allocation5]  }
   0x3   :  { %s16_s10 = sshll.u32 %s970_s9, 4  ;;  %s26_s12 = sshll.u32 %s971_s11, 4  ;;  %s17_s10 = int_to_ptr.vmem [resolvable:$true] %s16_s10  ;;  %s27_s12 = int_to_ptr.vmem [resolvable:$true] %s26_s12 }
   0x4   :  { %s898_s15 = scalar_lea.hbm %s1898_s0, 256 }
   0x5   :  { %p899_p0 = scmp.ne.s32.totalorder %s1898_s0, %s898_s15  ;;  %p902_p1 = scmp.lt.u32.totalorder %s898_s15, %s1898_s0 }
   0x7   :  { %p904_p2 = pnand %p902_p1, %p899_p0 }
   0x9   :  { %907 = shalt.err (!%p904_p2)
}
   0xa   :  { %s908_s20 = scalar_lea.vmem %s17_s10, 256  ;;  %p913_p4 = scmp.lt.s32.totalorder %s17_s10, %s17_s10 }
   0xb   :  { %p909_p3 = scmp.ne.s32.totalorder %s17_s10, %s908_s20  ;;  %p914_p5 = scmp.lt.s32.totalorder %s908_s20, %s908_s20 }
   0xd   :  { %p915_p6 = por %p914_p5, %p913_p4 }
   0xf   :  { %p916_p7 = pnand %p915_p6, %p909_p3 }
  0x11   :  { %919 = shalt.err (!%p916_p7)
}
  0x12   :  { %19 = dma.hbm_to_vmem [thread:$0]  %s1898_s0, 256, %s17_s10, [#allocation3]  }
  0x13   :  { %s920_s25 = scalar_lea.hbm %s1899_s1, 256 }
  0x14   :  { %p921_p8 = scmp.ne.s32.totalorder %s1899_s1, %s920_s25  ;;  %p924_p9 = scmp.lt.u32.totalorder %s920_s25, %s1899_s1 }
  0x16   :  { %p926_p10 = pnand %p924_p9, %p921_p8 }
  0x18   :  { %929 = shalt.err (!%p926_p10)
}
  0x19   :  { %s930_s30 = scalar_lea.vmem %s27_s12, 256  ;;  %p935_p12 = scmp.lt.s32.totalorder %s27_s12, %s27_s12 }
  0x1a   :  { %p931_p11 = scmp.ne.s32.totalorder %s27_s12, %s930_s30  ;;  %p936_p13 = scmp.lt.s32.totalorder %s930_s30, %s930_s30 }
  0x1c   :  { %p937_p0 = por %p936_p13, %p935_p12 }
  0x1e   :  { %p938_p1 = pnand %p937_p0, %p931_p11 }
  0x20   :  { %941 = shalt.err (!%p938_p1)
}
  0x21   :  { %29 = dma.hbm_to_vmem [thread:$0]  %s1899_s1, 256, %s27_s12, [#allocation6]  }
  0x22   :  { %964 = dma.done.wait [#allocation3], 256  }
  0x23   :  { %965 = vsyncadd [#allocation3], 4294967040 }
  0x24   :  { %966 = dma.done.wait [#allocation6], 256  }
  0x25   :  { %967 = vsyncadd [#allocation6], 4294967040  ;;  %v1016_v0 = vld [vmem:[#allocation5] sm:$0xff]  ;;  %s972_s4 = smov 112   ;;  %s973_s5 = smov 16   ;;  %v1022_v1 = vld [vmem:[#allocation5 + $0x8] sm:$0xff]  ;;  %v40_v4 = vlaneseq }
  0x26   :  { %82 = vrot.lane.b32.xlu1 %v1016_v0, %s972_s4  ;;  %75 = vrot.lane.b32.xlu0 %v1016_v0, %s973_s5  ;;  %s974_s1 = smov 1   ;;  %s975_s6 = smov 127   ;;  %v1036_v2 = vld [vmem:[#allocation2 + $0x8] sm:$0xff]  ;;  %v1038_v3 = vld [vmem:[#allocation2] sm:$0xff] }
  0x27   :  { %v1056_v5 = vand.u32 127, %v40_v4  ;;  %s976_s12 = smov [#allocation7]  }
  0x28   :  { %s863_s13 = sshll.u32 %s976_s12, 4  ;;  %s864_s13 = int_to_ptr.vmem [resolvable:$true] %s863_s13 }
  0x29   :  { %v1059_v8 = vadd.s32 128, %v1056_v5  ;;  %vm86_vm0 = vcmp.lt.s32.totalorder %v1056_v5, 112  ;;  %vm79_vm1 = vcmp.lt.s32.totalorder %v1056_v5, 16  ;;  %v47_v11 = vand.u32 15, %v1056_v5  ;;  %s942_s16 = scalar_lea.vmem %s864_s13, 128  ;;  %p947_p3 = scmp.lt.s32.totalorder %s864_s13, %s864_s13 }
  0x2a   :  { %84 = vrot.lane.b32.xlu1 %v1022_v1, %s972_s4  ;;  %77 = vrot.lane.b32.xlu0 %v1022_v1, %s973_s5  ;;  %vm71_vm2 = vcmp.ge.s32.totalorder %v1056_v5, 16  ;;  %vm109_vm4 = vcmp.lt.s32.totalorder %v1056_v5, 1  ;;  %vm116_vm7 = vcmp.lt.s32.totalorder %v1056_v5, 127  ;;  %vm835_vm10 = vcmp.eq.s32.totalorder %v1056_v5, 0  ;;  %p943_p2 = scmp.ne.s32.totalorder %s864_s13, %s942_s16  ;;  %p948_p4 = scmp.lt.s32.totalorder %s942_s16, %s942_s16 }
  0x2b   :  { %vm74_vm3 = vcmp.lt.s32.totalorder %v1059_v8, 240  ;;  %v54_v14 = vand.u32 15, %v1059_v8  ;;  %vm1072_vm5 = vcmp.ne.s32.totalorder %v47_v11, 0  ;;  %vm1076_vm6 = vcmp.ne.s32.totalorder %v47_v11, 15 }
  0x2c   :  { %vm838_vm11 = vcmp.eq.s32.totalorder %v1056_v5, 1  ;;  %vm841_vm12 = vcmp.eq.s32.totalorder %v1056_v5, 2  ;;  %vm844_vm13 = vcmp.eq.s32.totalorder %v1056_v5, 3  ;;  %vm847_vm14 = vcmp.eq.s32.totalorder %v1056_v5, 4  ;;  %p949_p5 = por %p948_p4, %p947_p3 }
  0x2d   :  { %vm1089_vm8 = vcmp.ne.s32.totalorder %v54_v14, 0  ;;  %vm1097_vm9 = vcmp.ne.s32.totalorder %v54_v14, 15  ;;  %vm850_vm15 = vcmp.eq.s32.totalorder %v1056_v5, 5 }
  0x2e   :  { %107 = vrot.lane.b32.xlu1 %v1022_v1, %s974_s1  ;;  %105 = vrot.lane.b32.xlu0 %v1016_v0, %s974_s1  ;;  %p950_p6 = pnand %p949_p5, %p943_p2 }
  0x32   :  { %114 = vrot.lane.b32.xlu1 %v1022_v1, %s975_s6  ;;  %112 = vrot.lane.b32.xlu0 %v1016_v0, %s975_s6 }
  0x36   :  { %429 = vrot.lane.b32.xlu1 %v1036_v2, %s973_s5  ;;  %427 = vrot.lane.b32.xlu0 %v1038_v3, %s973_s5 }
  0x3a   :  { %435 = vrot.lane.b32.xlu1 %v1036_v2, %s972_s4  ;;  %433 = vrot.lane.b32.xlu0 %v1038_v3, %s972_s4 }
  0x3e   :  { %449 = vrot.lane.b32.xlu1 %v1036_v2, %s974_s1  ;;  %447 = vrot.lane.b32.xlu0 %v1038_v3, %s974_s1 }
  0x42   :  { %455 = vrot.lane.b32.xlu1 %v1036_v2, %s975_s6  ;;  %453 = vrot.lane.b32.xlu0 %v1038_v3, %s975_s6 }
  0x98   :  { %v83_v6 = vpop.permute.xlu1 %82  ;;  %v76_v7 = vpop.permute.xlu0 %75 }
  0x9c   :  { %v85_v9 = vpop.permute.xlu1 %84  ;;  %v78_v10 = vpop.permute.xlu0 %77 }
  0x9d   :  { %v88_v12 = vsel %vm86_vm0, %v85_v9, %v83_v6  ;;  %v81_v13 = vsel %vm79_vm1, %v78_v10, %v76_v7  ;;  %v87_v19 = vsel %vm86_vm0, %v83_v6, %v85_v9  ;;  %v80_v21 = vsel %vm79_vm1, %v76_v7, %v78_v10 }
  0x9e   :  { %v100_v20 = vsel %vm74_vm3, %v88_v12, inf  ;;  %v93_v22 = vsel %vm71_vm2, %v81_v13, inf }
  0x9f   :  { %v101_v29 = vmin.f32 %v93_v22, %v87_v19  ;;  %v102_v30 = vmin.f32 %v80_v21, %v100_v20 }
  0xa0   :  { %v108_v15 = vpop.permute.xlu1 %107  ;;  %v106_v16 = vpop.permute.xlu0 %105 }
  0xa1   :  { %v110_v24 = vsel %vm109_vm4, %v106_v16, %v108_v15  ;;  %v111_v25 = vsel %vm109_vm4, %v108_v15, %v106_v16  ;;  %v103_v41 = vmin.f32 %v1016_v0, %v101_v29  ;;  %v104_v42 = vmin.f32 %v1022_v1, %v102_v30 }
  0xa2   :  { %v123_v33 = vsel %vm1072_vm5, %v111_v25, inf  ;;  %v124_v34 = vsel %vm1089_vm8, %v110_v24, inf }
  0xa4   :  { %v115_v27 = vpop.permute.xlu1 %114  ;;  %v113_v28 = vpop.permute.xlu0 %112 }
  0xa5   :  { %v117_v31 = vsel %vm116_vm7, %v113_v28, %v115_v27  ;;  %v118_v32 = vsel %vm116_vm7, %v115_v27, %v113_v28 }
  0xa6   :  { %v129_v35 = vsel %vm1076_vm6, %v117_v31, inf  ;;  %v130_v36 = vsel %vm1097_vm9, %v118_v32, inf }
  0xa7   :  { %v131_v37 = vmin.f32 %v123_v33, %v129_v35  ;;  %v132_v38 = vmin.f32 %v124_v34, %v130_v36 }
  0xa8   :  { %v430_v39 = vpop.permute.xlu1 %429  ;;  %v428_v40 = vpop.permute.xlu0 %427 }
  0xa9   :  { %v133_v43 = vmin.f32 %v1016_v0, %v131_v37  ;;  %v134_v44 = vmin.f32 %v1022_v1, %v132_v38  ;;  %v432_v50 = vsel %vm79_vm1, %v430_v39, %v428_v40  ;;  %v431_v58 = vsel %vm79_vm1, %v428_v40, %v430_v39 }
  0xaa   :  { %v439_v55 = vsel %vm71_vm2, %v432_v50, inf }
  0xab   :  { %v1117_v45 = vmin.f32 %v103_v41, %v133_v43  ;;  %v1119_v46 = vmin.f32 %v104_v42, %v134_v44 }
  0xac   :  { %v436_v47 = vpop.permute.xlu1 %435  ;;  %v434_v48 = vpop.permute.xlu0 %433 }
  0xad   :  { %139 = vrot.lane.b32.xlu1 %v1119_v46, %s974_s1  ;;  %137 = vrot.lane.b32.xlu0 %v1117_v45, %s974_s1  ;;  %v438_v49 = vsel %vm86_vm0, %v436_v47, %v434_v48  ;;  %v437_v53 = vsel %vm86_vm0, %v434_v48, %v436_v47 }
  0xae   :  { %v442_v54 = vsel %vm74_vm3, %v438_v49, inf  ;;  %v443_v59 = vmin.f32 %v439_v55, %v437_v53 }
  0xaf   :  { %v444_v62 = vmin.f32 %v431_v58, %v442_v54 }
  0xb0   :  { %v450_v51 = vpop.permute.xlu1 %449  ;;  %v448_v52 = vpop.permute.xlu0 %447  ;;  %v445_v13 = vmin.f32 %v1038_v3, %v443_v59 }
  0xb1   :  { %145 = vrot.lane.b32.xlu1 %v1119_v46, %s975_s6  ;;  %143 = vrot.lane.b32.xlu0 %v1117_v45, %s975_s6  ;;  %v451_v56 = vsel %vm109_vm4, %v448_v52, %v450_v51  ;;  %v452_v57 = vsel %vm109_vm4, %v450_v51, %v448_v52  ;;  %v446_v14 = vmin.f32 %v1036_v2, %v444_v62 }
  0xb2   :  { %v459_v6 = vsel %vm1072_vm5, %v452_v57, inf  ;;  %v460_v7 = vsel %vm1089_vm8, %v451_v56, inf }
  0xb4   :  { %v456_v60 = vpop.permute.xlu1 %455  ;;  %v454_v61 = vpop.permute.xlu0 %453 }
  0xb5   :  { %v457_v63 = vsel %vm116_vm7, %v454_v61, %v456_v60  ;;  %v458_v4 = vsel %vm116_vm7, %v456_v60, %v454_v61  ;;  %183 = vrot.lane.b32.xlu1 %v1119_v46, %s973_s5  ;;  %181 = vrot.lane.b32.xlu0 %v1117_v45, %s973_s5 }
  0xb6   :  { %v461_v9 = vsel %vm1076_vm6, %v457_v63, inf  ;;  %v462_v10 = vsel %vm1097_vm9, %v458_v4, inf }
  0xb7   :  { %v463_v11 = vmin.f32 %v459_v6, %v461_v9  ;;  %v464_v12 = vmin.f32 %v460_v7, %v462_v10 }
  0xb9   :  { %v465_v15 = vmin.f32 %v1038_v3, %v463_v11  ;;  %v466_v16 = vmin.f32 %v1036_v2, %v464_v12  ;;  %189 = vrot.lane.b32.xlu1 %v1119_v46, %s972_s4  ;;  %187 = vrot.lane.b32.xlu0 %v1117_v45, %s972_s4 }
  0xbb   :  { %v1169_v19 = vmin.f32 %v445_v13, %v465_v15  ;;  %v1171_v20 = vmin.f32 %v446_v14, %v466_v16 }
  0xbd   :  { %471 = vrot.lane.b32.xlu1 %v1171_v20, %s974_s1  ;;  %469 = vrot.lane.b32.xlu0 %v1169_v19, %s974_s1 }
  0xc1   :  { %477 = vrot.lane.b32.xlu1 %v1171_v20, %s975_s6  ;;  %475 = vrot.lane.b32.xlu0 %v1169_v19, %s975_s6 }
  0xc5   :  { %515 = vrot.lane.b32.xlu1 %v1171_v20, %s973_s5  ;;  %513 = vrot.lane.b32.xlu0 %v1169_v19, %s973_s5 }
  0xc9   :  { %521 = vrot.lane.b32.xlu1 %v1171_v20, %s972_s4  ;;  %519 = vrot.lane.b32.xlu0 %v1169_v19, %s972_s4 }
 0x11f   :  { %v140_v21 = vpop.permute.xlu1 %139  ;;  %v138_v22 = vpop.permute.xlu0 %137 }
 0x120   :  { %v141_v24 = vsel %vm109_vm4, %v138_v22, %v140_v21  ;;  %v142_v25 = vsel %vm109_vm4, %v140_v21, %v138_v22 }
 0x121   :  { %v149_v31 = vsel %vm1072_vm5, %v142_v25, -inf  ;;  %v150_v32 = vsel %vm1089_vm8, %v141_v24, -inf  ;;  %v201_v42 = vsel %vm1072_vm5, %v142_v25, inf  ;;  %v202_v43 = vsel %vm1089_vm8, %v141_v24, inf }
 0x123   :  { %v146_v27 = vpop.permute.xlu1 %145  ;;  %v144_v28 = vpop.permute.xlu0 %143 }
 0x124   :  { %v147_v29 = vsel %vm116_vm7, %v144_v28, %v146_v27  ;;  %v148_v30 = vsel %vm116_vm7, %v146_v27, %v144_v28 }
 0x125   :  { %v151_v33 = vsel %vm1076_vm6, %v147_v29, -inf  ;;  %v152_v34 = vsel %vm1097_vm9, %v148_v30, -inf  ;;  %v203_v39 = vsel %vm1076_vm6, %v147_v29, inf  ;;  %v204_v40 = vsel %vm1097_vm9, %v148_v30, inf }
 0x126   :  { %v1205_v35 = vmax.f32 %v149_v31, %v151_v33  ;;  %v1207_v36 = vmax.f32 %v150_v32, %v152_v34  ;;  %v205_v44 = vmin.f32 %v201_v42, %v203_v39  ;;  %v206_v49 = vmin.f32 %v202_v43, %v204_v40 }
 0x127   :  { %v184_v37 = vpop.permute.xlu1 %183  ;;  %v182_v38 = vpop.permute.xlu0 %181 }
 0x128   :  { %v186_v41 = vsel %vm79_vm1, %v184_v37, %v182_v38  ;;  %v185_v53 = vsel %vm79_vm1, %v182_v38, %v184_v37  ;;  %v207_v57 = vmin.f32 %v1117_v45, %v205_v44  ;;  %v208_v61 = vmin.f32 %v1119_v46, %v206_v49 }
 0x129   :  { %v193_v50 = vsel %vm71_vm2, %v186_v41, inf }
 0x12b   :  { %v190_v47 = vpop.permute.xlu1 %189  ;;  %v188_v48 = vpop.permute.xlu0 %187 }
 0x12c   :  { %v191_v51 = vsel %vm86_vm0, %v188_v48, %v190_v47  ;;  %v192_v52 = vsel %vm86_vm0, %v190_v47, %v188_v48 }
 0x12d   :  { %v196_v54 = vsel %vm74_vm3, %v192_v52, inf  ;;  %v197_v55 = vmin.f32 %v193_v50, %v191_v51 }
 0x12e   :  { %v198_v56 = vmin.f32 %v185_v53, %v196_v54 }
 0x12f   :  { %v199_v58 = vmin.f32 %v1117_v45, %v197_v55  ;;  %v472_v59 = vpop.permute.xlu1 %471  ;;  %v470_v60 = vpop.permute.xlu0 %469 }
 0x130   :  { %v200_v62 = vmin.f32 %v1119_v46, %v198_v56  ;;  %v473_v6 = vsel %vm109_vm4, %v470_v60, %v472_v59  ;;  %v474_v7 = vsel %vm109_vm4, %v472_v59, %v470_v60 }
 0x131   :  { %v1233_v63 = vmin.f32 %v199_v58, %v207_v57  ;;  %v481_v13 = vsel %vm1072_vm5, %v474_v7, -inf  ;;  %v482_v14 = vsel %vm1089_vm8, %v473_v6, -inf  ;;  %v533_v30 = vsel %vm1072_vm5, %v474_v7, inf }
 0x132   :  { %v1235_v4 = vmin.f32 %v200_v62, %v208_v61  ;;  %v534_v31 = vsel %vm1089_vm8, %v473_v6, inf }
 0x133   :  { %v478_v9 = vpop.permute.xlu1 %477  ;;  %211 = vrot.lane.b32.xlu0 %v1233_v63, %s974_s1  ;;  %v476_v10 = vpop.permute.xlu0 %475 }
 0x134   :  { %v479_v11 = vsel %vm116_vm7, %v476_v10, %v478_v9  ;;  %v480_v12 = vsel %vm116_vm7, %v478_v9, %v476_v10  ;;  %213 = vrot.lane.b32.xlu1 %v1235_v4, %s974_s1 }
 0x135   :  { %v483_v15 = vsel %vm1076_vm6, %v479_v11, -inf  ;;  %v484_v16 = vsel %vm1097_vm9, %v480_v12, -inf  ;;  %v535_v27 = vsel %vm1076_vm6, %v479_v11, inf  ;;  %v536_v28 = vsel %vm1097_vm9, %v480_v12, inf }
 0x136   :  { %v1257_v21 = vmax.f32 %v481_v13, %v483_v15  ;;  %v1259_v22 = vmax.f32 %v482_v14, %v484_v16  ;;  %v537_v32 = vmin.f32 %v533_v30, %v535_v27  ;;  %v538_v37 = vmin.f32 %v534_v31, %v536_v28 }
 0x137   :  { %v516_v24 = vpop.permute.xlu1 %515  ;;  %217 = vrot.lane.b32.xlu0 %v1233_v63, %s975_s6  ;;  %v514_v25 = vpop.permute.xlu0 %513 }
 0x138   :  { %219 = vrot.lane.b32.xlu1 %v1235_v4, %s975_s6  ;;  %v518_v29 = vsel %vm79_vm1, %v516_v24, %v514_v25  ;;  %v517_v41 = vsel %vm79_vm1, %v514_v25, %v516_v24  ;;  %v539_v47 = vmin.f32 %v1169_v19, %v537_v32  ;;  %v540_v49 = vmin.f32 %v1171_v20, %v538_v37 }
 0x139   :  { %v525_v38 = vsel %vm71_vm2, %v518_v29, inf }
 0x13b   :  { %v522_v33 = vpop.permute.xlu1 %521  ;;  %263 = vrot.lane.b32.xlu0 %v1233_v63, %s973_s5  ;;  %v520_v34 = vpop.permute.xlu0 %519 }
 0x13c   :  { %v523_v39 = vsel %vm86_vm0, %v520_v34, %v522_v33  ;;  %v524_v40 = vsel %vm86_vm0, %v522_v33, %v520_v34  ;;  %265 = vrot.lane.b32.xlu1 %v1235_v4, %s973_s5 }
 0x13d   :  { %v528_v42 = vsel %vm74_vm3, %v524_v40, inf  ;;  %v529_v43 = vmin.f32 %v525_v38, %v523_v39 }
 0x13e   :  { %v530_v44 = vmin.f32 %v517_v41, %v528_v42 }
 0x13f   :  { %v531_v48 = vmin.f32 %v1169_v19, %v529_v43  ;;  %269 = vrot.lane.b32.xlu0 %v1233_v63, %s972_s4 }
 0x140   :  { %v532_v50 = vmin.f32 %v1171_v20, %v530_v44  ;;  %271 = vrot.lane.b32.xlu1 %v1235_v4, %s972_s4 }
 0x141   :  { %v1297_v51 = vmin.f32 %v531_v48, %v539_v47 }
 0x142   :  { %v1299_v52 = vmin.f32 %v532_v50, %v540_v49 }
 0x143   :  { %543 = vrot.lane.b32.xlu0 %v1297_v51, %s974_s1 }
 0x144   :  { %545 = vrot.lane.b32.xlu1 %v1299_v52, %s974_s1 }
 0x147   :  { %549 = vrot.lane.b32.xlu0 %v1297_v51, %s975_s6 }
 0x148   :  { %551 = vrot.lane.b32.xlu1 %v1299_v52, %s975_s6 }
 0x14b   :  { %595 = vrot.lane.b32.xlu0 %v1297_v51, %s973_s5 }
 0x14c   :  { %597 = vrot.lane.b32.xlu1 %v1299_v52, %s973_s5 }
 0x14f   :  { %601 = vrot.lane.b32.xlu0 %v1297_v51, %s972_s4 }
 0x150   :  { %603 = vrot.lane.b32.xlu1 %v1299_v52, %s972_s4 }
 0x1a5   :  { %v212_v53 = vpop.permute.xlu0 %211 }
 0x1a6   :  { %v214_v54 = vpop.permute.xlu1 %213 }
 0x1a7   :  { %v215_v55 = vsel %vm109_vm4, %v212_v53, %v214_v54  ;;  %v216_v56 = vsel %vm109_vm4, %v214_v54, %v212_v53 }
 0x1a8   :  { %v223_v61 = vsel %vm1072_vm5, %v216_v56, -inf  ;;  %v224_v62 = vsel %vm1089_vm8, %v215_v55, -inf  ;;  %v283_v16 = vsel %vm1072_vm5, %v216_v56, inf  ;;  %v284_v25 = vsel %vm1089_vm8, %v215_v55, inf }
 0x1a9   :  { %v218_v57 = vpop.permute.xlu0 %217 }
 0x1aa   :  { %v220_v58 = vpop.permute.xlu1 %219 }
 0x1ab   :  { %v221_v59 = vsel %vm116_vm7, %v218_v57, %v220_v58  ;;  %v222_v60 = vsel %vm116_vm7, %v220_v58, %v218_v57 }
 0x1ac   :  { %v225_v6 = vsel %vm1076_vm6, %v221_v59, -inf  ;;  %v226_v7 = vsel %vm1097_vm9, %v222_v60, -inf  ;;  %v285_v13 = vsel %vm1076_vm6, %v221_v59, inf  ;;  %v286_v14 = vsel %vm1097_vm9, %v222_v60, inf }
 0x1ad   :  { %v1333_v9 = vmax.f32 %v223_v61, %v225_v6  ;;  %v1335_v10 = vmax.f32 %v224_v62, %v226_v7  ;;  %v264_v11 = vpop.permute.xlu0 %263  ;;  %v287_v27 = vmin.f32 %v283_v16, %v285_v13  ;;  %v288_v29 = vmin.f32 %v284_v25, %v286_v14 }
 0x1ae   :  { %v266_v12 = vpop.permute.xlu1 %265 }
 0x1af   :  { %v268_v15 = vsel %vm79_vm1, %v266_v12, %v264_v11  ;;  %v267_v33 = vsel %vm79_vm1, %v264_v11, %v266_v12  ;;  %v289_v40 = vmin.f32 %v1233_v63, %v287_v27  ;;  %v290_v43 = vmin.f32 %v1235_v4, %v288_v29 }
 0x1b0   :  { %v275_v30 = vsel %vm71_vm2, %v268_v15, inf }
 0x1b1   :  { %v270_v24 = vpop.permute.xlu0 %269 }
 0x1b2   :  { %v272_v28 = vpop.permute.xlu1 %271 }
 0x1b3   :  { %v273_v31 = vsel %vm86_vm0, %v270_v24, %v272_v28  ;;  %v274_v32 = vsel %vm86_vm0, %v272_v28, %v270_v24 }
 0x1b4   :  { %v278_v34 = vsel %vm74_vm3, %v274_v32, inf  ;;  %v279_v37 = vmin.f32 %v275_v30, %v273_v31 }
 0x1b5   :  { %v280_v38 = vmin.f32 %v267_v33, %v278_v34  ;;  %v544_v39 = vpop.permute.xlu0 %543 }
 0x1b6   :  { %v281_v41 = vmin.f32 %v1233_v63, %v279_v37  ;;  %v546_v42 = vpop.permute.xlu1 %545 }
 0x1b7   :  { %v282_v44 = vmin.f32 %v1235_v4, %v280_v38  ;;  %v547_v49 = vsel %vm109_vm4, %v544_v39, %v546_v42  ;;  %v548_v50 = vsel %vm109_vm4, %v546_v42, %v544_v39 }
 0x1b8   :  { %v1361_v47 = vmin.f32 %v281_v41, %v289_v40  ;;  %v555_v57 = vsel %vm1072_vm5, %v548_v50, -inf  ;;  %v556_v58 = vsel %vm1089_vm8, %v547_v49, -inf  ;;  %v615_v14 = vsel %vm1072_vm5, %v548_v50, inf }
 0x1b9   :  { %v1363_v48 = vmin.f32 %v282_v44, %v290_v43  ;;  %v550_v53 = vpop.permute.xlu0 %549  ;;  %v616_v16 = vsel %vm1089_vm8, %v547_v49, inf }
 0x1ba   :  { %v552_v54 = vpop.permute.xlu1 %551  ;;  %293 = vrot.lane.b32.xlu0 %v1361_v47, %s974_s1 }
 0x1bb   :  { %v553_v55 = vsel %vm116_vm7, %v550_v53, %v552_v54  ;;  %v554_v56 = vsel %vm116_vm7, %v552_v54, %v550_v53  ;;  %295 = vrot.lane.b32.xlu1 %v1363_v48, %s974_s1 }
 0x1bc   :  { %v557_v59 = vsel %vm1076_vm6, %v553_v55, -inf  ;;  %v558_v60 = vsel %vm1097_vm9, %v554_v56, -inf  ;;  %v617_v11 = vsel %vm1076_vm6, %v553_v55, inf  ;;  %v618_v12 = vsel %vm1097_vm9, %v554_v56, inf }
 0x1bd   :  { %v1385_v61 = vmax.f32 %v555_v57, %v557_v59  ;;  %v1387_v62 = vmax.f32 %v556_v58, %v558_v60  ;;  %v596_v6 = vpop.permute.xlu0 %595  ;;  %v619_v24 = vmin.f32 %v615_v14, %v617_v11  ;;  %v620_v27 = vmin.f32 %v616_v16, %v618_v12 }
 0x1be   :  { %v598_v7 = vpop.permute.xlu1 %597  ;;  %299 = vrot.lane.b32.xlu0 %v1361_v47, %s975_s6 }
 0x1bf   :  { %301 = vrot.lane.b32.xlu1 %v1363_v48, %s975_s6  ;;  %v600_v13 = vsel %vm79_vm1, %v598_v7, %v596_v6  ;;  %v599_v31 = vsel %vm79_vm1, %v596_v6, %v598_v7  ;;  %v621_v37 = vmin.f32 %v1297_v51, %v619_v24  ;;  %v622_v39 = vmin.f32 %v1299_v52, %v620_v27 }
 0x1c0   :  { %v607_v28 = vsel %vm71_vm2, %v600_v13, inf }
 0x1c1   :  { %v602_v15 = vpop.permute.xlu0 %601 }
 0x1c2   :  { %v604_v25 = vpop.permute.xlu1 %603  ;;  %345 = vrot.lane.b32.xlu0 %v1361_v47, %s973_s5 }
 0x1c3   :  { %v605_v29 = vsel %vm86_vm0, %v602_v15, %v604_v25  ;;  %v606_v30 = vsel %vm86_vm0, %v604_v25, %v602_v15  ;;  %347 = vrot.lane.b32.xlu1 %v1363_v48, %s973_s5 }
 0x1c4   :  { %v610_v32 = vsel %vm74_vm3, %v606_v30, inf  ;;  %v611_v33 = vmin.f32 %v607_v28, %v605_v29 }
 0x1c5   :  { %v612_v34 = vmin.f32 %v599_v31, %v610_v32 }
 0x1c6   :  { %v613_v38 = vmin.f32 %v1297_v51, %v611_v33  ;;  %351 = vrot.lane.b32.xlu0 %v1361_v47, %s972_s4 }
 0x1c7   :  { %v614_v40 = vmin.f32 %v1299_v52, %v612_v34  ;;  %353 = vrot.lane.b32.xlu1 %v1363_v48, %s972_s4 }
 0x1c8   :  { %v1425_v41 = vmin.f32 %v613_v38, %v621_v37 }
 0x1c9   :  { %v1427_v42 = vmin.f32 %v614_v40, %v622_v39 }
 0x1ca   :  { %625 = vrot.lane.b32.xlu0 %v1425_v41, %s974_s1 }
 0x1cb   :  { %627 = vrot.lane.b32.xlu1 %v1427_v42, %s974_s1 }
 0x1ce   :  { %631 = vrot.lane.b32.xlu0 %v1425_v41, %s975_s6 }
 0x1cf   :  { %633 = vrot.lane.b32.xlu1 %v1427_v42, %s975_s6 }
 0x1d2   :  { %677 = vrot.lane.b32.xlu0 %v1425_v41, %s973_s5 }
 0x1d3   :  { %679 = vrot.lane.b32.xlu1 %v1427_v42, %s973_s5 }
 0x1d6   :  { %683 = vrot.lane.b32.xlu0 %v1425_v41, %s972_s4 }
 0x1d7   :  { %685 = vrot.lane.b32.xlu1 %v1427_v42, %s972_s4 }
 0x22c   :  { %v294_v43 = vpop.permute.xlu0 %293 }
 0x22d   :  { %v296_v44 = vpop.permute.xlu1 %295 }
 0x22e   :  { %v1455_v56 = vsel %vm109_vm4, %v296_v44, %v294_v43  ;;  %v1459_v58 = vsel %vm109_vm4, %v294_v43, %v296_v44 }
 0x22f   :  { %v365_v7 = vsel %vm1072_vm5, %v1455_v56, inf  ;;  %v366_v12 = vsel %vm1089_vm8, %v1459_v58, inf }
 0x230   :  { %v300_v49 = vpop.permute.xlu0 %299 }
 0x231   :  { %v302_v50 = vpop.permute.xlu1 %301 }
 0x232   :  { %v1447_v53 = vsel %vm116_vm7, %v300_v49, %v302_v50  ;;  %v1451_v54 = vsel %vm116_vm7, %v302_v50, %v300_v49 }
 0x233   :  { %v367_v59 = vsel %vm1076_vm6, %v1447_v53, inf  ;;  %v368_v60 = vsel %vm1097_vm9, %v1451_v54, inf }
 0x234   :  { %v346_v55 = vpop.permute.xlu0 %345  ;;  %v369_v13 = vmin.f32 %v365_v7, %v367_v59  ;;  %v370_v15 = vmin.f32 %v366_v12, %v368_v60 }
 0x235   :  { %v348_v57 = vpop.permute.xlu1 %347 }
 0x236   :  { %v350_v6 = vsel %vm79_vm1, %v348_v57, %v346_v55  ;;  %v349_v27 = vsel %vm79_vm1, %v346_v55, %v348_v57  ;;  %v371_v34 = vmin.f32 %v1361_v47, %v369_v13  ;;  %v372_v37 = vmin.f32 %v1363_v48, %v370_v15 }
 0x237   :  { %v357_v16 = vsel %vm71_vm2, %v350_v6, inf }
 0x238   :  { %v352_v11 = vpop.permute.xlu0 %351 }
 0x239   :  { %v354_v14 = vpop.permute.xlu1 %353 }
 0x23a   :  { %v355_v24 = vsel %vm86_vm0, %v352_v11, %v354_v14  ;;  %v356_v25 = vsel %vm86_vm0, %v354_v14, %v352_v11 }
 0x23b   :  { %v360_v28 = vsel %vm74_vm3, %v356_v25, inf  ;;  %v361_v29 = vmin.f32 %v357_v16, %v355_v24 }
 0x23c   :  { %v362_v30 = vmin.f32 %v349_v27, %v360_v28  ;;  %v626_v31 = vpop.permute.xlu0 %625 }
 0x23d   :  { %v363_v32 = vmin.f32 %v1361_v47, %v361_v29  ;;  %v628_v33 = vpop.permute.xlu1 %627 }
 0x23e   :  { %v364_v38 = vmin.f32 %v1363_v48, %v362_v30  ;;  %v1507_v57 = vsel %vm109_vm4, %v628_v33, %v626_v31  ;;  %v1511_v60 = vsel %vm109_vm4, %v626_v31, %v628_v33 }
 0x23f   :  { %v1489_v40 = vmin.f32 %v363_v32, %v371_v34  ;;  %v697_v12 = vsel %vm1072_vm5, %v1507_v57, inf  ;;  %v698_v14 = vsel %vm1089_vm8, %v1511_v60, inf }
 0x240   :  { %v632_v39 = vpop.permute.xlu0 %631  ;;  %v1491_v43 = vmin.f32 %v364_v38, %v372_v37 }
 0x241   :  { %v634_v44 = vpop.permute.xlu1 %633  ;;  %375 = vrot.lane.b32.xlu0 %v1489_v40, %s974_s1 }
 0x242   :  { %377 = vrot.lane.b32.xlu1 %v1491_v43, %s974_s1  ;;  %v1499_v49 = vsel %vm116_vm7, %v632_v39, %v634_v44  ;;  %v1503_v50 = vsel %vm116_vm7, %v634_v44, %v632_v39 }
 0x243   :  { %v699_v6 = vsel %vm1076_vm6, %v1499_v49, inf  ;;  %v700_v7 = vsel %vm1097_vm9, %v1503_v50, inf }
 0x244   :  { %v678_v55 = vpop.permute.xlu0 %677  ;;  %v701_v15 = vmin.f32 %v697_v12, %v699_v6  ;;  %v702_v24 = vmin.f32 %v698_v14, %v700_v7  ;;  %v1614_v6 = vmax.f32 %v1299_v52, %v1387_v62  ;;  %v308_v7 = vsel %vm1097_vm9, %v1451_v54, -inf }
 0x245   :  { %v680_v59 = vpop.permute.xlu1 %679  ;;  %381 = vrot.lane.b32.xlu0 %v1489_v40, %s975_s6 }
 0x246   :  { %v682_v11 = vsel %vm79_vm1, %v680_v59, %v678_v55  ;;  %383 = vrot.lane.b32.xlu1 %v1491_v43, %s975_s6  ;;  %v681_v29 = vsel %vm79_vm1, %v678_v55, %v680_v59  ;;  %v703_v33 = vmin.f32 %v1425_v41, %v701_v15  ;;  %v704_v37 = vmin.f32 %v1427_v42, %v702_v24 }
 0x247   :  { %v689_v25 = vsel %vm71_vm2, %v682_v11, inf  ;;  %v1559_v55 = vmax.f32 %v1117_v45, %v1205_v35  ;;  %v1563_v59 = vmax.f32 %v1119_v46, %v1207_v36  ;;  %v1575_v35 = vmax.f32 %v1233_v63, %v1333_v9 }
 0x248   :  { %v684_v13 = vpop.permute.xlu0 %683  ;;  %v1579_v36 = vmax.f32 %v1235_v4, %v1335_v10  ;;  %v1591_v9 = vmax.f32 %v1169_v19, %v1257_v21  ;;  %v1595_v10 = vmax.f32 %v1171_v20, %v1259_v22  ;;  %v1607_v21 = vmax.f32 %v1297_v51, %v1385_v61 }
 0x249   :  { %v686_v16 = vpop.permute.xlu1 %685  ;;  %v307_v22 = vsel %vm1076_vm6, %v1447_v53, -inf  ;;  %v305_v61 = vsel %vm1072_vm5, %v1455_v56, -inf  ;;  %v306_v53 = vsel %vm1089_vm8, %v1459_v58, -inf  ;;  %v639_v56 = vsel %vm1076_vm6, %v1499_v49, -inf }
 0x24a   :  { %v687_v27 = vsel %vm86_vm0, %v684_v13, %v686_v16  ;;  %v688_v28 = vsel %vm86_vm0, %v686_v16, %v684_v13  ;;  %v309_v62 = vmax.f32 %v305_v61, %v307_v22  ;;  %v310_v11 = vmax.f32 %v306_v53, %v308_v7 }
 0x24b   :  { %v692_v30 = vsel %vm74_vm3, %v688_v28, inf  ;;  %v693_v31 = vmin.f32 %v689_v25, %v687_v27  ;;  %v640_v58 = vsel %vm1097_vm9, %v1503_v50, -inf  ;;  %v637_v13 = vsel %vm1072_vm5, %v1507_v57, -inf }
 0x24c   :  { %v694_v32 = vmin.f32 %v681_v29, %v692_v30  ;;  %v1634_v54 = vmax.f32 %v1361_v47, %v309_v62  ;;  %v1640_v12 = vmax.f32 %v1363_v48, %v310_v11  ;;  %v638_v49 = vsel %vm1089_vm8, %v1511_v60, -inf }
 0x24d   :  { %v695_v34 = vmin.f32 %v1425_v41, %v693_v31  ;;  %v641_v14 = vmax.f32 %v637_v13, %v639_v56  ;;  %v642_v15 = vmax.f32 %v638_v49, %v640_v58 }
 0x24e   :  { %v696_v38 = vmin.f32 %v1427_v42, %v694_v32 }
 0x24f   :  { %v1545_v39 = vmin.f32 %v695_v34, %v703_v33  ;;  %v1660_v50 = vmax.f32 %v1425_v41, %v641_v14  ;;  %v1663_v57 = vmax.f32 %v1427_v42, %v642_v15 }
 0x250   :  { %v1547_v44 = vmin.f32 %v696_v38, %v704_v37 }
 0x251   :  { %707 = vrot.lane.b32.xlu0 %v1545_v39, %s974_s1 }
 0x252   :  { %709 = vrot.lane.b32.xlu1 %v1547_v44, %s974_s1 }
 0x255   :  { %713 = vrot.lane.b32.xlu0 %v1545_v39, %s975_s6 }
 0x256   :  { %715 = vrot.lane.b32.xlu1 %v1547_v44, %s975_s6 }
 0x259   :  { %157 = vrot.lane.b32.xlu0 %v1559_v55, %s973_s5 }
 0x25a   :  { %159 = vrot.lane.b32.xlu1 %v1563_v59, %s973_s5 }
 0x25d   :  { %163 = vrot.lane.b32.xlu0 %v1559_v55, %s972_s4 }
 0x25e   :  { %165 = vrot.lane.b32.xlu1 %v1563_v59, %s972_s4 }
 0x261   :  { %231 = vrot.lane.b32.xlu0 %v1575_v35, %s973_s5 }
 0x262   :  { %233 = vrot.lane.b32.xlu1 %v1579_v36, %s973_s5 }
 0x265   :  { %237 = vrot.lane.b32.xlu0 %v1575_v35, %s972_s4 }
 0x266   :  { %239 = vrot.lane.b32.xlu1 %v1579_v36, %s972_s4 }
 0x269   :  { %489 = vrot.lane.b32.xlu0 %v1591_v9, %s973_s5 }
 0x26a   :  { %491 = vrot.lane.b32.xlu1 %v1595_v10, %s973_s5 }
 0x26d   :  { %495 = vrot.lane.b32.xlu0 %v1591_v9, %s972_s4 }
 0x26e   :  { %497 = vrot.lane.b32.xlu1 %v1595_v10, %s972_s4 }
 0x271   :  { %563 = vrot.lane.b32.xlu0 %v1607_v21, %s973_s5 }
 0x272   :  { %565 = vrot.lane.b32.xlu1 %v1614_v6, %s973_s5 }
 0x275   :  { %569 = vrot.lane.b32.xlu0 %v1607_v21, %s972_s4 }
 0x276   :  { %571 = vrot.lane.b32.xlu1 %v1614_v6, %s972_s4 }
 0x279   :  { %313 = vrot.lane.b32.xlu0 %v1634_v54, %s973_s5 }
 0x27a   :  { %315 = vrot.lane.b32.xlu1 %v1640_v12, %s973_s5 }
 0x27d   :  { %319 = vrot.lane.b32.xlu0 %v1634_v54, %s972_s4 }
 0x27e   :  { %321 = vrot.lane.b32.xlu1 %v1640_v12, %s972_s4 }
 0x281   :  { %645 = vrot.lane.b32.xlu0 %v1660_v50, %s973_s5 }
 0x282   :  { %647 = vrot.lane.b32.xlu1 %v1663_v57, %s973_s5 }
 0x285   :  { %651 = vrot.lane.b32.xlu0 %v1660_v50, %s972_s4 }
 0x286   :  { %653 = vrot.lane.b32.xlu1 %v1663_v57, %s972_s4 }
 0x2b3   :  { %v376_v60 = vpop.permute.xlu0 %375 }
 0x2b4   :  { %v378_v16 = vpop.permute.xlu1 %377 }
 0x2b5   :  { %v379_v24 = vsel %vm109_vm4, %v376_v60, %v378_v16  ;;  %v380_v25 = vsel %vm109_vm4, %v378_v16, %v376_v60 }
 0x2b6   :  { %v387_v31 = vsel %vm1072_vm5, %v380_v25, -inf  ;;  %v388_v32 = vsel %vm1089_vm8, %v379_v24, -inf }
 0x2b7   :  { %v382_v27 = vpop.permute.xlu0 %381 }
 0x2b8   :  { %v384_v28 = vpop.permute.xlu1 %383 }
 0x2b9   :  { %v385_v29 = vsel %vm116_vm7, %v382_v27, %v384_v28  ;;  %v386_v30 = vsel %vm116_vm7, %v384_v28, %v382_v27 }
 0x2ba   :  { %v389_v33 = vsel %vm1076_vm6, %v385_v29, -inf  ;;  %v390_v34 = vsel %vm1097_vm9, %v386_v30, -inf  ;;  %v781_v30 = vadd.f32 %v1022_v1, %v1016_v0 }
 0x2bb   :  { %v391_v37 = vmax.f32 %v387_v31, %v389_v33  ;;  %v392_v38 = vmax.f32 %v388_v32, %v390_v34  ;;  %v771_v31 = vadd.f32 %v1036_v2, %v1038_v3 }
 0x2bd   :  { %v1690_v22 = vmax.f32 %v1491_v43, %v392_v38  ;;  %v1693_v7 = vmax.f32 %v1489_v40, %v391_v37 }
 0x2bf   :  { %397 = vrot.lane.b32.xlu1 %v1690_v22, %s973_s5  ;;  %395 = vrot.lane.b32.xlu0 %v1693_v7, %s973_s5 }
 0x2c3   :  { %v708_v61 = vpop.permute.xlu0 %707  ;;  %403 = vrot.lane.b32.xlu1 %v1690_v22, %s972_s4  ;;  %401 = vrot.lane.b32.xlu0 %v1693_v7, %s972_s4 }
 0x2c4   :  { %v710_v53 = vpop.permute.xlu1 %709 }
 0x2c5   :  { %v711_v43 = vsel %vm109_vm4, %v708_v61, %v710_v53  ;;  %v712_v40 = vsel %vm109_vm4, %v710_v53, %v708_v61 }
 0x2c6   :  { %v719_v13 = vsel %vm1072_vm5, %v712_v40, -inf  ;;  %v720_v49 = vsel %vm1089_vm8, %v711_v43, -inf }
 0x2c7   :  { %v714_v62 = vpop.permute.xlu0 %713 }
 0x2c8   :  { %v716_v11 = vpop.permute.xlu1 %715 }
 0x2c9   :  { %v717_v56 = vsel %vm116_vm7, %v714_v62, %v716_v11  ;;  %v718_v58 = vsel %vm116_vm7, %v716_v11, %v714_v62 }
 0x2ca   :  { %v721_v14 = vsel %vm1076_vm6, %v717_v56, -inf  ;;  %v722_v15 = vsel %vm1097_vm9, %v718_v58, -inf }
 0x2cb   :  { %v723_v60 = vmax.f32 %v719_v13, %v721_v14  ;;  %v724_v16 = vmax.f32 %v720_v49, %v722_v15  ;;  %v158_v17 = vpop.permute.xlu0 %157 }
 0x2cc   :  { %v160_v18 = vpop.permute.xlu1 %159 }
 0x2cd   :  { %v1720_v24 = vmax.f32 %v1545_v39, %v723_v60  ;;  %v1723_v25 = vmax.f32 %v1547_v44, %v724_v16  ;;  %v759_v39 = vmul.f32 %v1016_v0, %v1038_v3  ;;  %v760_v44 = vmul.f32 %v1022_v1, %v1036_v2 }
 0x2ce   :  { %v162_v40 = vsel %vm79_vm1, %v160_v18, %v158_v17 }
 0x2cf   :  { %729 = vrot.lane.b32.xlu1 %v1723_v25, %s973_s5  ;;  %727 = vrot.lane.b32.xlu0 %v1720_v24, %s973_s5  ;;  %v164_v23 = vpop.permute.xlu0 %163  ;;  %v761_v27 = vadd.f32 %v760_v44, %v759_v39  ;;  %v169_v49 = vsel %vm71_vm2, %v162_v40, -inf  ;;  %v161_v39 = vsel %vm79_vm1, %v158_v17, %v160_v18 }
 0x2d0   :  { %v166_v26 = vpop.permute.xlu1 %165 }
 0x2d1   :  { %v167_v2 = vsel %vm86_vm0, %v164_v23, %v166_v26  ;;  %v168_v3 = vsel %vm86_vm0, %v166_v26, %v164_v23 }
 0x2d2   :  { %v172_v15 = vsel %vm74_vm3, %v168_v3, -inf  ;;  %v173_v60 = vmax.f32 %v169_v49, %v167_v2 }
 0x2d3   :  { %735 = vrot.lane.b32.xlu1 %v1723_v25, %s972_s4  ;;  %733 = vrot.lane.b32.xlu0 %v1720_v24, %s972_s4  ;;  %v232_v28 = vpop.permute.xlu0 %231 }
 0x2d4   :  { %v234_v29 = vpop.permute.xlu1 %233 }
 0x2d5   :  { %v236_v58 = vsel %vm79_vm1, %v234_v29, %v232_v28  ;;  %v235_v23 = vsel %vm79_vm1, %v232_v28, %v234_v29 }
 0x2d6   :  { %v243_v16 = vsel %vm71_vm2, %v236_v58, -inf }
 0x2d7   :  { %v238_v32 = vpop.permute.xlu0 %237 }
 0x2d8   :  { %v240_v33 = vpop.permute.xlu1 %239 }
 0x2d9   :  { %v242_v62 = vsel %vm86_vm0, %v240_v33, %v238_v32  ;;  %v241_v13 = vsel %vm86_vm0, %v238_v32, %v240_v33  ;;  %v175_v32 = vmax.f32 %v1559_v55, %v173_v60 }
 0x2da   :  { %v246_v14 = vsel %vm74_vm3, %v242_v62, -inf  ;;  %v247_v26 = vmax.f32 %v243_v16, %v241_v13 }
 0x2db   :  { %v1741_v34 = vpop.permute.xlu0 %489  ;;  %v248_v44 = vmax.f32 %v235_v23, %v246_v14  ;;  %v177_v2 = vsub.f32 %v1016_v0, %v175_v32 }
 0x2dc   :  { %v492_v37 = vpop.permute.xlu1 %491  ;;  %v249_v33 = vmax.f32 %v1575_v35, %v247_v26 }
 0x2dd   :  { %v250_v40 = vmax.f32 %v1579_v36, %v248_v44 }
 0x2de   :  { %v251_v29 = vsub.f32 %v1117_v45, %v249_v33 }
 0x2df   :  { %v496_v38 = vpop.permute.xlu0 %495  ;;  %v252_v17 = vsub.f32 %v1119_v46, %v250_v40  ;;  %v493_v40 = vsel %vm79_vm1, %v1741_v34, %v492_v37 }
 0x2e0   :  { %v498_v61 = vpop.permute.xlu1 %497  ;;  %v253_v36 = vmax.f32 %v251_v29, 0.0 }
 0x2e1   :  { %v500_v0 = vsel %vm86_vm0, %v498_v61, %v496_v38  ;;  %v254_v14 = vmax.f32 %v252_v17, 0.0 }
 0x2e2   :  { %v504_v60 = vsel %vm74_vm3, %v500_v0, -inf }
 0x2e3   :  { %v564_v53 = vpop.permute.xlu0 %563 }
 0x2e4   :  { %v566_v43 = vpop.permute.xlu1 %565 }
 0x2e5   :  { %v568_v55 = vsel %vm79_vm1, %v566_v43, %v564_v53  ;;  %v567_v16 = vsel %vm79_vm1, %v564_v53, %v566_v43 }
 0x2e7   :  { %v570_v11 = vpop.permute.xlu0 %569 }
 0x2e8   :  { %v572_v56 = vpop.permute.xlu1 %571 }
 0x2e9   :  { %v574_v18 = vsel %vm86_vm0, %v572_v56, %v570_v11  ;;  %v573_v45 = vsel %vm86_vm0, %v570_v11, %v572_v56  ;;  %v575_v11 = vsel %vm71_vm2, %v568_v55, -inf }
 0x2ea   :  { %v578_v13 = vsel %vm74_vm3, %v574_v18, -inf  ;;  %v579_v23 = vmax.f32 %v575_v11, %v573_v45  ;;  %v1822_v45 = vld [vmem:[#allocation2] sm:$0xff] }
 0x2f2   :  { %762 = vadd.xlane.f32.xlu0 %v761_v27  ;;  %v314_v27 = vpop.permute.xlu0 %313 }
 0x2f6   :  { %782 = vadd.xlane.f32.xlu0 %v781_v30  ;;  %v316_v30 = vpop.permute.xlu1 %315  ;;  %v320_v3 = vpop.permute.xlu0 %319 }
 0x2f7   :  { %772 = vadd.xlane.f32.xlu1 %v771_v31  ;;  %v174_v31 = vmax.f32 %v161_v39, %v172_v15  ;;  %v318_v46 = vsel %vm79_vm1, %v316_v30, %v314_v27  ;;  %v499_v15 = vsel %vm86_vm0, %v496_v38, %v498_v61  ;;  %v580_v38 = vmax.f32 %v567_v16, %v578_v13 }
 0x2f8   :  { %v325_v26 = vsel %vm71_vm2, %v318_v46, -inf  ;;  %v317_v61 = vsel %vm79_vm1, %v314_v27, %v316_v30 }
 0x2f9   :  { %v176_v62 = vmax.f32 %v1563_v59, %v174_v31  ;;  %v179_v59 = vmax.f32 %v177_v2, 0.0  ;;  %v506_v2 = vmax.f32 %v493_v40, %v504_v60  ;;  %v582_v29 = vmax.f32 %v1614_v6, %v580_v38 }
 0x2fa   :  { %v322_v28 = vpop.permute.xlu1 %321  ;;  %v646_v31 = vpop.permute.xlu0 %645 }
 0x2fb   :  { %v178_v58 = vsub.f32 %v1022_v1, %v176_v62  ;;  %v324_v35 = vsel %vm86_vm0, %v322_v28, %v320_v3  ;;  %v494_v1 = vsel %vm79_vm1, %v492_v37, %v1741_v34  ;;  %v323_v49 = vsel %vm86_vm0, %v320_v3, %v322_v28 }
 0x2fc   :  { %v328_v56 = vsel %vm74_vm3, %v324_v35, -inf  ;;  %v501_v39 = vsel %vm71_vm2, %v494_v1, -inf  ;;  %v329_v44 = vmax.f32 %v325_v26, %v323_v49  ;;  %v255_v62 = vmul.f32 %v253_v36, %v179_v59 }
 0x2fd   :  { %v180_v33 = vmax.f32 %v178_v58, 0.0  ;;  %v505_v53 = vmax.f32 %v501_v39, %v499_v15  ;;  %v330_v43 = vmax.f32 %v317_v61, %v328_v56  ;;  %v581_v28 = vmax.f32 %v1607_v21, %v579_v23 }
 0x2fe   :  { %v648_v32 = vpop.permute.xlu1 %647  ;;  %v331_v17 = vmax.f32 %v1634_v54, %v329_v44  ;;  %v257_v18 = vsub.f32 %v253_v36, %v255_v62  ;;  %v508_v58 = vmax.f32 %v1595_v10, %v506_v2  ;;  %v652_v55 = vpop.permute.xlu0 %651  ;;  %v584_v0 = vsub.f32 %v1171_v20, %v582_v29  ;;  %v1828_v10 = vld [vmem:[#allocation2 + $0x8] sm:$0xff] }
 0x2ff   :  { %v256_v3 = vmul.f32 %v254_v14, %v180_v33  ;;  %v507_v27 = vmax.f32 %v1591_v9, %v505_v53  ;;  %v332_v30 = vmax.f32 %v1640_v12, %v330_v43  ;;  %v583_v35 = vsub.f32 %v1169_v19, %v581_v28 }
 0x300   :  { %v333_v21 = vsub.f32 %v1233_v63, %v331_v17  ;;  %v259_v12 = vmax.f32 %v257_v18, 0.0  ;;  %v510_v46 = vsub.f32 %v1828_v10, %v508_v58  ;;  %v650_v20 = vsel %vm79_vm1, %v648_v32, %v646_v31 }
 0x301   :  { %v258_v37 = vsub.f32 %v254_v14, %v256_v3  ;;  %v509_v6 = vsub.f32 %v1822_v45, %v507_v27  ;;  %v334_v9 = vsub.f32 %v1235_v4, %v332_v30  ;;  %v585_v19 = vmax.f32 %v583_v35, 0.0 }
 0x302   :  { %v654_v34 = vpop.permute.xlu1 %653  ;;  %v586_v63 = vmax.f32 %v584_v0, 0.0  ;;  %v335_v1 = vmax.f32 %v333_v21, 0.0  ;;  %v512_v15 = vmax.f32 %v510_v46, 0.0  ;;  %v261_v11 = vadd.f32 %v259_v12, %v179_v59 }
 0x303   :  { %v656_v54 = vsel %vm86_vm0, %v654_v34, %v652_v55  ;;  %v260_v36 = vmax.f32 %v258_v37, 0.0  ;;  %v655_v13 = vsel %vm86_vm0, %v652_v55, %v654_v34  ;;  %v511_v49 = vmax.f32 %v509_v6, 0.0 }
 0x304   :  { %v660_v4 = vsel %vm74_vm3, %v656_v54, -inf  ;;  %v336_v14 = vmax.f32 %v334_v9, 0.0  ;;  %v649_v56 = vsel %vm79_vm1, %v646_v31, %v648_v32  ;;  %v657_v60 = vsel %vm71_vm2, %v650_v20, -inf }
 0x305   :  { %v661_v16 = vmax.f32 %v657_v60, %v655_v13  ;;  %v662_v23 = vmax.f32 %v649_v56, %v660_v4  ;;  %v262_v26 = vadd.f32 %v260_v36, %v180_v33  ;;  %v587_v39 = vmul.f32 %v585_v19, %v511_v49 }
 0x306   :  { %v588_v38 = vmul.f32 %v586_v63, %v512_v15  ;;  %v337_v61 = vmul.f32 %v335_v1, %v261_v11 }
 0x307   :  { %v338_v53 = vmul.f32 %v336_v14, %v262_v26  ;;  %v663_v59 = vmax.f32 %v1660_v50, %v661_v16  ;;  %v664_v62 = vmax.f32 %v1663_v57, %v662_v23  ;;  %v589_v31 = vsub.f32 %v585_v19, %v587_v39 }
 0x308   :  { %v590_v32 = vsub.f32 %v586_v63, %v588_v38  ;;  %v339_v2 = vsub.f32 %v335_v1, %v337_v61 }
 0x309   :  { %v340_v27 = vsub.f32 %v336_v14, %v338_v53  ;;  %v665_v18 = vsub.f32 %v1297_v51, %v663_v59  ;;  %v666_v58 = vsub.f32 %v1299_v52, %v664_v62  ;;  %v591_v35 = vmax.f32 %v589_v31, 0.0 }
 0x30a   :  { %v341_v34 = vmax.f32 %v339_v2, 0.0  ;;  %v592_v0 = vmax.f32 %v590_v32, 0.0 }
 0x30b   :  { %v342_v6 = vmax.f32 %v340_v27, 0.0  ;;  %v667_v54 = vmax.f32 %v665_v18, 0.0  ;;  %v668_v12 = vmax.f32 %v666_v58, 0.0  ;;  %v593_v51 = vadd.f32 %v591_v35, %v511_v49 }
 0x30c   :  { %v343_v19 = vadd.f32 %v341_v34, %v261_v11  ;;  %v594_v63 = vadd.f32 %v592_v0, %v512_v15  ;;  %v897_v0 = vld [vmem:[#allocation5 + $0x8] sm:$0xff] }
 0x30d   :  { %v344_v52 = vadd.f32 %v342_v6, %v262_v26  ;;  %v669_v13 = vmul.f32 %v667_v54, %v593_v51 }
 0x30e   :  { %v670_v56 = vmul.f32 %v668_v12, %v594_v63 }
 0x30f   :  { %v671_v23 = vsub.f32 %v667_v54, %v669_v13 }
 0x310   :  { %v672_v49 = vsub.f32 %v668_v12, %v670_v56 }
 0x311   :  { %v673_v31 = vmax.f32 %v671_v23, 0.0 }
 0x331   :  { %v398_v44 = vpop.permute.xlu1 %397  ;;  %v396_v40 = vpop.permute.xlu0 %395 }
 0x332   :  { %v400_v43 = vsel %vm79_vm1, %v398_v44, %v396_v40  ;;  %v399_v50 = vsel %vm79_vm1, %v396_v40, %v398_v44 }
 0x333   :  { %v407_v33 = vsel %vm71_vm2, %v400_v43, -inf }
 0x335   :  { %v404_v3 = vpop.permute.xlu1 %403  ;;  %v402_v28 = vpop.permute.xlu0 %401 }
 0x336   :  { %v405_v29 = vsel %vm86_vm0, %v402_v28, %v404_v3  ;;  %v406_v17 = vsel %vm86_vm0, %v404_v3, %v402_v28 }
 0x337   :  { %v410_v57 = vsel %vm74_vm3, %v406_v17, -inf  ;;  %v411_v30 = vmax.f32 %v407_v33, %v405_v29  ;;  %v674_v33 = vmax.f32 %v672_v49, 0.0 }
 0x338   :  { %v412_v55 = vmax.f32 %v399_v50, %v410_v57  ;;  %v675_v50 = vadd.f32 %v673_v31, %v593_v51 }
 0x339   :  { %v413_v37 = vmax.f32 %v1693_v7, %v411_v30 }
 0x33a   :  { %v414_v21 = vmax.f32 %v1690_v22, %v412_v55 }
 0x33b   :  { %v415_v9 = vsub.f32 %v1361_v47, %v413_v37  ;;  %v896_v37 = vld [vmem:[#allocation5] sm:$0xff] }
 0x33c   :  { %v416_v46 = vsub.f32 %v1363_v48, %v414_v21 }
 0x33d   :  { %v417_v36 = vmax.f32 %v415_v9, 0.0 }
 0x33e   :  { %v418_v20 = vmax.f32 %v416_v46, 0.0 }
 0x33f   :  { %v419_v1 = vmul.f32 %v417_v36, %v343_v19 }
 0x340   :  { %v420_v14 = vmul.f32 %v418_v20, %v344_v52 }
 0x341   :  { %v730_v7 = vpop.permute.xlu1 %729  ;;  %v728_v4 = vpop.permute.xlu0 %727  ;;  %v421_v22 = vsub.f32 %v417_v36, %v419_v1 }
 0x342   :  { %v732_v47 = vsel %vm79_vm1, %v730_v7, %v728_v4  ;;  %v422_v60 = vsub.f32 %v418_v20, %v420_v14  ;;  %v731_v44 = vsel %vm79_vm1, %v728_v4, %v730_v7 }
 0x343   :  { %v423_v16 = vmax.f32 %v421_v22, 0.0  ;;  %v739_v15 = vsel %vm71_vm2, %v732_v47, -inf }
 0x344   :  { %v424_v11 = vmax.f32 %v422_v60, 0.0 }
 0x345   :  { %v736_v48 = vpop.permute.xlu1 %735  ;;  %v734_v39 = vpop.permute.xlu0 %733  ;;  %v425_v61 = vadd.f32 %v423_v16, %v343_v19 }
 0x346   :  { %v737_v26 = vsel %vm86_vm0, %v734_v39, %v736_v48  ;;  %v738_v38 = vsel %vm86_vm0, %v736_v48, %v734_v39  ;;  %v426_v43 = vadd.f32 %v424_v11, %v344_v52  ;;  %vm853_vm0 = vcmp.eq.s32.totalorder %v1056_v5, 6 }
 0x347   :  { %v742_v40 = vsel %vm74_vm3, %v738_v38, -inf  ;;  %v743_v53 = vmax.f32 %v739_v15, %v737_v26  ;;  %v791_v62 = vmul.f32 %v1822_v45, %v425_v61  ;;  %v676_v45 = vadd.f32 %v674_v33, %v594_v63 }
 0x348   :  { %v744_v59 = vmax.f32 %v731_v44, %v742_v40  ;;  %v803_v2 = vadd.f32 %v426_v43, %v425_v61  ;;  %v792_v3 = vmul.f32 %v1828_v10, %v426_v43 }
 0x349   :  { %v745_v32 = vmax.f32 %v1720_v24, %v743_v53 }
 0x34a   :  { %v746_v28 = vmax.f32 %v1723_v25, %v744_v59  ;;  %804 = vadd.xlane.f32.xlu1 %v803_v2  ;;  %v793_v17 = vadd.f32 %v792_v3, %v791_v62 }
 0x34b   :  { %v747_v29 = vsub.f32 %v1425_v41, %v745_v32 }
 0x34c   :  { %v748_v8 = vsub.f32 %v1427_v42, %v746_v28  ;;  %794 = vadd.xlane.f32.xlu0 %v793_v17 }
 0x34d   :  { %v749_v27 = vmax.f32 %v747_v29, 0.0 }
 0x34e   :  { %v750_v57 = vmax.f32 %v748_v8, 0.0 }
 0x34f   :  { %v751_v30 = vmul.f32 %v749_v27, %v675_v50 }
 0x350   :  { %v752_v18 = vmul.f32 %v750_v57, %v676_v45 }
 0x351   :  { %v753_v24 = vsub.f32 %v749_v27, %v751_v30 }
 0x352   :  { %v754_v58 = vsub.f32 %v750_v57, %v752_v18 }
 0x353   :  { %v755_v55 = vmax.f32 %v753_v24, 0.0 }
 0x354   :  { %v756_v10 = vmax.f32 %v754_v58, 0.0 }
 0x355   :  { %v757_v34 = vadd.f32 %v755_v55, %v675_v50 }
 0x356   :  { %v758_v25 = vadd.f32 %v756_v10, %v676_v45 }
 0x357   :  { %v813_v35 = vmul.f32 %v896_v37, %v757_v34 }
 0x358   :  { %v825_v41 = vadd.f32 %v758_v25, %v757_v34  ;;  %v814_v21 = vmul.f32 %v897_v0, %v758_v25 }
 0x35a   :  { %826 = vadd.xlane.f32.xlu1 %v825_v41  ;;  %v815_v42 = vadd.f32 %v814_v21, %v813_v35 }
 0x35c   :  { %816 = vadd.xlane.f32.xlu0 %v815_v42 }
 0x37f   :  { %v763_v6 = vpop.xlane.xlu0 %762 }
 0x380   :  { %v764_v9 = vrot.slane %v763_v6, 4 }
 0x382   :  { %v765_v54 = vadd.f32 %v764_v9, %v763_v6 }
 0x383   :  { %v783_v12 = vpop.xlane.xlu0 %782 }
 0x384   :  { %v766_v46 = vrot.slane %v765_v54, 2  ;;  %v773_v36 = vpop.xlane.xlu1 %772  ;;  %v784_v19 = vrot.slane %v783_v12, 4 }
 0x385   :  { %v774_v51 = vrot.slane %v773_v36, 4 }
 0x386   :  { %v785_v20 = vadd.f32 %v784_v19, %v783_v12  ;;  %v767_v52 = vadd.f32 %v766_v46, %v765_v54 }
 0x387   :  { %v775_v63 = vadd.f32 %v774_v51, %v773_v36 }
 0x388   :  { %v786_v1 = vrot.slane %v785_v20, 2  ;;  %v768_v13 = vrot.slane %v767_v52, 1 }
 0x389   :  { %v776_v7 = vrot.slane %v775_v63, 2 }
 0x38a   :  { %v769_v4 = vadd.f32 %v768_v13, %v767_v52  ;;  %v787_v14 = vadd.f32 %v786_v1, %v785_v20 }
 0x38b   :  { %v777_v56 = vadd.f32 %v776_v7, %v775_v63 }
 0x38c   :  { %873 = vpush %v769_v4  ;;  %v788_v22 = vrot.slane %v787_v14, 1 }
 0x38d   :  { %v778_v47 = vrot.slane %v777_v56, 1 }
 0x38e   :  { %v789_v60 = vadd.f32 %v788_v22, %v787_v14 }
 0x38f   :  { %v779_v16 = vadd.f32 %v778_v47, %v777_v56 }
 0x391   :  { %875 = vpush %v779_v16 }
 0x392   :  { %877 = vpush %v789_v60 }
 0x3bd   :  { %s874_s7 = spop %873 }
 0x3be   :  { %v836_v30 = vstv %s874_s7 }
 0x3bf   :  { %v837_v18 = vsel %vm835_vm10, %v836_v30, 0.0 }
 0x3c2   :  { %s876_s8 = spop %875 }
 0x3c3   :  { %v839_v24 = vstv %s876_s8  ;;  %s878_s9 = spop %877 }
 0x3c4   :  { %v840_v58 = vsel %vm838_vm11, %v839_v24, %v837_v18  ;;  %v842_v55 = vstv %s878_s9 }
 0x3c5   :  { %v843_v10 = vsel %vm841_vm12, %v842_v55, %v840_v58 }
 0x3d7   :  { %v805_v23 = vpop.xlane.xlu1 %804 }
 0x3d8   :  { %v806_v48 = vrot.slane %v805_v23, 4 }
 0x3d9   :  { %v795_v39 = vpop.xlane.xlu0 %794 }
 0x3da   :  { %v807_v11 = vadd.f32 %v806_v48, %v805_v23  ;;  %v796_v49 = vrot.slane %v795_v39, 4 }
 0x3dc   :  { %v808_v15 = vrot.slane %v807_v11, 2  ;;  %v797_v26 = vadd.f32 %v796_v49, %v795_v39 }
 0x3de   :  { %v798_v38 = vrot.slane %v797_v26, 2  ;;  %v809_v61 = vadd.f32 %v808_v15, %v807_v11 }
 0x3e0   :  { %v799_v44 = vadd.f32 %v798_v38, %v797_v26  ;;  %v810_v40 = vrot.slane %v809_v61, 1 }
 0x3e2   :  { %v800_v53 = vrot.slane %v799_v44, 1  ;;  %v811_v59 = vadd.f32 %v810_v40, %v809_v61 }
 0x3e4   :  { %v801_v43 = vadd.f32 %v800_v53, %v799_v44 }
 0x3e6   :  { %879 = vpush %v801_v43 }
 0x3e7   :  { %v827_v62 = vpop.xlane.xlu1 %826  ;;  %881 = vpush %v811_v59 }
 0x3e8   :  { %v828_v31 = vrot.slane %v827_v62, 4 }
 0x3e9   :  { %v817_v32 = vpop.xlane.xlu0 %816 }
 0x3ea   :  { %v829_v2 = vadd.f32 %v828_v31, %v827_v62  ;;  %v818_v3 = vrot.slane %v817_v32, 4 }
 0x3ec   :  { %v830_v28 = vrot.slane %v829_v2, 2  ;;  %v819_v33 = vadd.f32 %v818_v3, %v817_v32 }
 0x3ee   :  { %v831_v29 = vadd.f32 %v830_v28, %v829_v2  ;;  %v820_v17 = vrot.slane %v819_v33, 2 }
 0x3f0   :  { %v821_v8 = vadd.f32 %v820_v17, %v819_v33  ;;  %v832_v27 = vrot.slane %v831_v29, 1 }
 0x3f2   :  { %v822_v50 = vrot.slane %v821_v8, 1  ;;  %v833_v45 = vadd.f32 %v832_v27, %v831_v29 }
 0x3f4   :  { %v823_v57 = vadd.f32 %v822_v50, %v821_v8 }
 0x3f6   :  { %883 = vpush %v823_v57 }
 0x3f7   :  { %885 = vpush %v833_v45 }
 0x417   :  { %s880_s10 = spop %879 }
 0x418   :  { %v845_v34 = vstv %s880_s10  ;;  %s882_s11 = spop %881 }
 0x419   :  { %v846_v25 = vsel %vm844_vm13, %v845_v34, %v843_v10  ;;  %v848_v37 = vstv %s882_s11 }
 0x41a   :  { %v849_v35 = vsel %vm847_vm14, %v848_v37, %v846_v25 }
 0x427   :  { %s884_s14 = spop %883 }
 0x428   :  { %v851_v41 = vstv %s884_s14  ;;  %s886_s15 = spop %885 }
 0x429   :  { %v852_v0 = vsel %vm850_vm15, %v851_v41, %v849_v35  ;;  %v854_v21 = vstv %s886_s15 }
 0x42a   :  { %v855_v42 = vsel %vm853_vm0, %v854_v21, %v852_v0 }
 0x42b   :  { %856 = vst [vmem:[#allocation7] sm:$0xff] %v855_v42 }
 0x42c   :  { %953 = shalt.err (!%p950_p6)
}
 0x42d   :  { %s954_s19 = scalar_lea.hbm %s1900_s2, 128 }
 0x42e   :  { %p955_p7 = scmp.ne.s32.totalorder %s1900_s2, %s954_s19  ;;  %p958_p8 = scmp.lt.u32.totalorder %s954_s19, %s1900_s2 }
 0x430   :  { %p960_p9 = pnand %p958_p8, %p955_p7 }
 0x432   :  { %963 = shalt.err (!%p960_p9)
}
 0x433   :  { %866 = dma.vmem_to_hbm [thread:$0]  %s864_s13, 128, %s1900_s2, [#allocation4]  }
 0x434   :  { %968 = dma.done.wait [#allocation4], 128  }
 0x435   :  { %969 = vsyncadd [#allocation4], 4294967168 }
 0x436   :  { %870 = vsyncpa [#allocation3], 1 }
 0x437   :  { %871 = vsyncpa [#allocation6], 1 }
 0x438   :  { %872 = vsyncpa [#allocation4], 1 }

</bundles_post_ra>
